<compile_context>
chip_gen: v7x
topology: tpu7x:2x2x1
jax: 0.10.0
libtpu: 0.0.40
codegen_flags: <defaults>
</compile_context>

<pallas_src>
import functools

import jax
import jax.numpy as jnp
from jax import lax
from jax.experimental import pallas as pl
from jax.experimental.pallas import tpu as pltpu


def _round_up(x, m):
    return ((x + m - 1) // m) * m


def _vmem_capacity_bytes():
    """Physical VMEM of the attached TPU; conservative fallback if unavailable."""
    try:
        info = pltpu.get_tpu_info()
        cap = getattr(info, "vmem_capacity_bytes", None)
        if cap:
            return int(cap)
    except Exception:
        pass
    return 64 * 1024 * 1024   # v7x per-TC size: the safe lower bound.


def _flash_self_attn_kernel(gamma_ref, xq_ref, xkv_ref, wq_ref, bq_ref,
                            wkv_ref, bkv_ref, o_ref,
                            q_scr, m_scr, l_scr, acc_scr, k_cache, v_cache):
    """One (batch, q-tile, kv-tile) grid step of flash self-attention.

    xq_ref : (tq, Cp)  f32 token-major query-side tile of x (padded channels)
    xkv_ref: (tk, Cp)  f32 token-major key/value-side tile of x (only read at qi==0)
    wq_ref : (Cp, Cqp) bf16 query projection, bq_ref (1, Cqp) f32
    wkv_ref: (Cp, Cqp+Cp) bf16 fused key|value projection, bkv_ref (1, Cqp+Cp) f32
    o_ref  : (tq, Cp)  f32  gamma * attn_out + x
    scratch: q (tq,Cqp) bf16; running max/sum (tq,1) f32; accumulator (tq,Cp) f32;
             K cache (N,Cqp) bf16; V cache (N,Cp) bf16 (current batch).
    """
    qi = pl.program_id(1)
    ki = pl.program_id(2)
    nk = pl.num_programs(2)
    cq = q_scr.shape[1]             # padded query/key channel count
    tk = xkv_ref.shape[0]
    row = pl.multiple_of(ki * tk, tk)

    @pl.when(ki == 0)
    def _init():
        m_scr[...] = jnp.full(m_scr.shape, -jnp.inf, jnp.float32)
        l_scr[...] = jnp.zeros(l_scr.shape, jnp.float32)
        acc_scr[...] = jnp.zeros(acc_scr.shape, jnp.float32)
        # Query projection for this (batch, q-tile): bf16 MXU inputs, f32 acc,
        # stored once as bf16 and resident across the kv loop.
        q = (jnp.dot(xq_ref[...].astype(jnp.bfloat16), wq_ref[...],
                     preferred_element_type=jnp.float32) + bq_ref[...])
        q_scr[...] = q.astype(jnp.bfloat16)

    # Fused K|V projection for this kv tile, computed only on the first q-tile
    # of each batch and cached in VMEM; later q-tiles reuse the cache.  Safe
    # because only the batch axis is core-parallel (qi/ki run sequentially).
    @pl.when(qi == 0)
    def _fill_kv():
        kv = (jnp.dot(xkv_ref[...].astype(jnp.bfloat16), wkv_ref[...],
                      preferred_element_type=jnp.float32) + bkv_ref[...])
        k_cache[pl.ds(row, tk), :] = kv[:, :cq].astype(jnp.bfloat16)
        v_cache[pl.ds(row, tk), :] = kv[:, cq:].astype(jnp.bfloat16)

    k = k_cache[pl.ds(row, tk), :]                         # (tk, Cqp) bf16
    v = v_cache[pl.ds(row, tk), :]                         # (tk, Cp)  bf16

    # scores[i, j] = q_i . k_j  — NT dot_general (no explicit k.T), bf16 MXU
    # inputs with f32 accumulation.
    s = lax.dot_general(
        q_scr[...], k,
        dimension_numbers=(((1,), (1,)), ((), ())),
        preferred_element_type=jnp.float32)                # (tq, tk)

    # Online softmax over the key axis (f32 VPU/EUP math).
    m_prev = m_scr[...]                                    # (tq, 1)
    m_new = jnp.maximum(m_prev, jnp.max(s, axis=-1, keepdims=True))
    alpha = jnp.exp(m_prev - m_new)                        # (tq, 1)
    p = jnp.exp(s - m_new)                                 # (tq, tk)
    l_scr[...] = alpha * l_scr[...] + jnp.sum(p, axis=-1, keepdims=True)
    acc_scr[...] = alpha * acc_scr[...] + jnp.dot(
        p.astype(jnp.bfloat16), v, preferred_element_type=jnp.float32)
    m_scr[...] = m_new

    @pl.when(ki == nk - 1)
    def _finalize():
        inv_l = pl.reciprocal(l_scr[...], approx=True)     # EUP reciprocal
        out = acc_scr[...] * inv_l                         # (tq, Cp)
        # Residual add in f32 (xq_ref is kept f32 precisely for this).
        o_ref[...] = (gamma_ref[0] * out + xq_ref[...]).astype(o_ref.dtype)


def self_attention(x, params, *, block_q=None, block_kv=None):
    """x: (B, C, H, W) float32.  params: dict of (C_in, C_out) weights, biases, gamma."""
    B, C, H, W = x.shape
    N = H * W
    assert C >= 8, "SelfAttention requires in_channels >= 8 (query/key = C // 8)"
    Cq = C // 8

    # Lane-dense channel padding (no-op when C, Cq are already multiples of 128).
    Cp = _round_up(C, 128)
    Cqp = _round_up(Cq, 128)

    def pick(blk):
        if blk is not None:
            assert N % blk == 0, "block size must divide H*W"
            return blk
        for cand in (512, 256, 128):   # prefer >=256: v6e/v7x MXU is 256-wide
            if N % cand == 0:
                return cand
        return N
    tq, tk = pick(block_q), pick(block_kv)

    # NCHW -> token-major (B, N, Cp).  x stays f32 for an exact residual add;
    # the kernel casts per-tile to bf16 for the projection MXU pushes.
    x_t = x.reshape(B, C, N).transpose(0, 2, 1)
    x_t = jnp.pad(x_t, ((0, 0), (0, 0), (0, Cp - C)))

    def pad2(w, rows, cols):
        return jnp.pad(w, ((0, rows - w.shape[0]), (0, cols - w.shape[1])))

    wq = pad2(params["wq"], Cp, Cqp).astype(jnp.bfloat16)              # (Cp, Cqp)
    bq = jnp.pad(params["bq"], (0, Cqp - Cq)).reshape(1, Cqp).astype(jnp.float32)
    wk = pad2(params["wk"], Cp, Cqp)
    bk = jnp.pad(params["bk"], (0, Cqp - Cq))
    wv = pad2(params["wv"], Cp, Cp)                                    # (Cp, Cp)
    bv = jnp.pad(params["bv"], (0, Cp - C))
    wkv = jnp.concatenate([wk, wv], axis=1).astype(jnp.bfloat16)       # (Cp, Cqp+Cp)
    bkv = jnp.concatenate([bk, bv]).reshape(1, Cqp + Cp).astype(jnp.float32)
    gamma = params["gamma"].astype(jnp.float32)

    # Scoped-VMEM budget: double-buffered I/O blocks + resident weights + scratch
    # (incl. per-batch K|V cache) + in-flight temporaries, 2x margin, floor
    # 32 MiB, capped at ~80% of physical VMEM (never request all of v7x's 64 MiB).
    bf16b, f32b, dbuf = 2, 4, 2
    io_bytes = dbuf * f32b * (tq * Cp + tk * Cp + tq * Cp)
    w_bytes = dbuf * (bf16b * (Cp * Cqp + Cp * (Cqp + Cp))
                      + f32b * (Cqp + (Cqp + Cp)))
    scratch_bytes = (bf16b * tq * Cqp + f32b * (2 * tq * 128 + tq * Cp)
                     + bf16b * N * (Cqp + Cp))
    live_bytes = f32b * (tk * (Cqp + Cp) + 2 * tq * tk + tq * Cp)
    need = io_bytes + w_bytes + scratch_bytes + live_bytes
    cap = _vmem_capacity_bytes()
    vmem_limit = int(min(max(2 * need, 32 * 1024 * 1024), (cap * 4) // 5))

    grid = (B, N // tq, N // tk)

    out_t = pl.pallas_call(
        _flash_self_attn_kernel,
        out_shape=jax.ShapeDtypeStruct((B, N, Cp), jnp.float32),
        grid_spec=pltpu.PrefetchScalarGridSpec(
            num_scalar_prefetch=0,
            grid=grid,
            in_specs=[
                pl.BlockSpec(memory_space=pltpu.MemorySpace.SMEM),            # gamma
                pl.BlockSpec((pl.Squeezed(), tq, Cp), lambda b, qi, ki: (b, qi, 0)),
                # x_kv: only consumed while filling the K|V cache (qi == 0);
                # collapse to a constant block afterwards so it is not re-DMA'd.
                pl.BlockSpec((pl.Squeezed(), tk, Cp),
                             lambda b, qi, ki: (b, jnp.where(qi == 0, ki, 0), 0)),
                pl.BlockSpec((Cp, Cqp), lambda b, qi, ki: (0, 0)),            # Wq (bf16)
                pl.BlockSpec((1, Cqp), lambda b, qi, ki: (0, 0)),             # bq (f32)
                pl.BlockSpec((Cp, Cqp + Cp), lambda b, qi, ki: (0, 0)),       # W[k|v] (bf16)
                pl.BlockSpec((1, Cqp + Cp), lambda b, qi, ki: (0, 0)),        # b[k|v] (f32)
            ],
            out_specs=pl.BlockSpec((pl.Squeezed(), tq, Cp),
                                   lambda b, qi, ki: (b, qi, 0)),
            scratch_shapes=[
                pltpu.VMEM((tq, Cqp), jnp.bfloat16),   # q tile (bf16, cast once)
                pltpu.VMEM((tq, 1), jnp.float32),      # running max
                pltpu.VMEM((tq, 1), jnp.float32),      # running sum
                pltpu.VMEM((tq, Cp), jnp.float32),     # output accumulator
                pltpu.VMEM((N, Cqp), jnp.bfloat16),    # K cache (current batch)
                pltpu.VMEM((N, Cp), jnp.bfloat16),     # V cache (current batch)
            ],
        ),
        compiler_params=pltpu.CompilerParams(
            # Batch-only core parallelism: the qi==0 K|V-cache fill is only
            # correct when the q axis is NOT sharded across TensorCores.
            dimension_semantics=("parallel", "arbitrary", "arbitrary"),
            vmem_limit_bytes=vmem_limit,
        ),
    )(gamma, x_t, x_t, wq, bq, wkv, bkv)

    # Strip channel padding and return to NCHW.
    return out_t[..., :C].transpose(0, 2, 1).reshape(B, C, H, W)


def self_attention_ref(x, params):
    """Pure-JAX reference mirroring the PyTorch forward exactly (f32)."""
    B, C, H, W = x.shape
    N = H * W
    xt = x.reshape(B, C, N).transpose(0, 2, 1)                 # (B, N, C)
    q = xt @ params["wq"] + params["bq"]                       # (B, N, C//8)
    k = xt @ params["wk"] + params["bk"]
    v = xt @ params["wv"] + params["bv"]                       # (B, N, C)
    attn = jax.nn.softmax(jnp.einsum("bic,bjc->bij", q, k), axis=-1)
    out = jnp.einsum("bij,bjc->bic", attn, v)                  # == bmm(value, attn^T)
    y = params["gamma"][0] * out + xt
    return y.transpose(0, 2, 1).reshape(B, C, H, W)


def init_params(key, C):
    """Synthetic parameters; weights stored as (C_in, C_out) (1x1 conv == matmul)."""
    Cq = C // 8
    ks = jax.random.split(key, 6)
    return {
        "wq": 0.05 * jax.random.normal(ks[0], (C, Cq), jnp.float32),
        "bq": 0.01 * jax.random.normal(ks[1], (Cq,), jnp.float32),
        "wk": 0.05 * jax.random.normal(ks[2], (C, Cq), jnp.float32),
        "bk": 0.01 * jax.random.normal(ks[3], (Cq,), jnp.float32),
        "wv": 0.05 * jax.random.normal(ks[4], (C, C), jnp.float32),
        "bv": 0.01 * jax.random.normal(ks[5], (C,), jnp.float32),
        # nn.Parameter(torch.zeros(1)) — gamma is 0 at init in the module.
        "gamma": jnp.zeros((1,), jnp.float32),
    }


if __name__ == "__main__":
    # N = H*W = 256 -> 2 query-tiles x 2 key-tiles at block 128: exercises the
    # online-softmax path, the K|V-cache fill (qi==0) and its reuse (qi==1).
    B, C, H, W = 2, 32, 16, 16
    key = jax.random.PRNGKey(0)
    kx, kp = jax.random.split(key)
    x = jax.random.normal(kx, (B, C, H, W), jnp.float32)
    params = init_params(kp, C)
    # gamma is 0 at module init, which would hide errors in the attention path;
    # test with a nonzero gamma so the full computation is checked.
    params["gamma"] = jnp.array([0.5], jnp.float32)

    run = jax.jit(functools.partial(self_attention, block_q=128, block_kv=128))
    y = jax.block_until_ready(run(x, params))

    y_ref = self_attention_ref(x, params)
    assert y.shape == (B, C, H, W)
    # Relaxed tolerance: bf16 MXU inputs for the projections / QK^T / PV and an
    # approx reciprocal in the softmax introduce ~1e-3-level error vs pure f32.
    assert jnp.allclose(y, y_ref, atol=1e-2, rtol=1e-2), "mismatch vs reference"
    print("KERNEL_OK")
</pallas_src>

<mosaic_0001>
module attributes {stable_mosaic.version = 11 : i64} {
  func.func @_flash_self_attn_kernel(%arg0: i32, %arg1: i32, %arg2: i32, %arg3: memref<1xf32, #tpu.memory_space<smem>>, %arg4: memref<1x128x128xf32, #tpu.memory_space<vmem>>, %arg5: memref<1x128x128xf32, #tpu.memory_space<vmem>>, %arg6: memref<128x128xbf16, #tpu.memory_space<vmem>>, %arg7: memref<1x128xf32, #tpu.memory_space<vmem>>, %arg8: memref<128x256xbf16, #tpu.memory_space<vmem>>, %arg9: memref<1x256xf32, #tpu.memory_space<vmem>>, %arg10: memref<1x128x128xf32, #tpu.memory_space<vmem>>, %arg11: memref<128x128xbf16, #tpu.memory_space<vmem>>, %arg12: memref<128x1xf32, #tpu.memory_space<vmem>>, %arg13: memref<128x1xf32, #tpu.memory_space<vmem>>, %arg14: memref<128x128xf32, #tpu.memory_space<vmem>>, %arg15: memref<256x128xbf16, #tpu.memory_space<vmem>>, %arg16: memref<256x128xbf16, #tpu.memory_space<vmem>>) attributes {dimension_semantics = [#tpu.dimension_semantics<parallel>, #tpu.dimension_semantics<arbitrary>, #tpu.dimension_semantics<arbitrary>], iteration_bounds = array<i64: 2, 2, 2>, scalar_prefetch = 0 : i64, scratch_operands = 6 : i64, tpu.core_type = #tpu.core_type<tc>, window_params = [{transform_indices = @transform_0, window_bounds = array<i64: 1>}, {transform_indices = @transform_1, window_bounds = array<i64: 1, 128, 128>}, {transform_indices = @transform_2, window_bounds = array<i64: 1, 128, 128>}, {pipeline_mode = #tpu.pipeline_mode<synchronous>, transform_indices = @transform_3, window_bounds = array<i64: 128, 128>}, {pipeline_mode = #tpu.pipeline_mode<synchronous>, transform_indices = @transform_4, window_bounds = array<i64: 1, 128>}, {pipeline_mode = #tpu.pipeline_mode<synchronous>, transform_indices = @transform_5, window_bounds = array<i64: 128, 256>}, {pipeline_mode = #tpu.pipeline_mode<synchronous>, transform_indices = @transform_6, window_bounds = array<i64: 1, 256>}, {transform_indices = @transform_7, window_bounds = array<i64: 1, 128, 128>}]} {
    %c128_i32 = arith.constant 128 : i32
    %0 = arith.muli %arg2, %c128_i32 : i32
    %1 = tpu.assume_multiple %0, 128 : i32
    %c0_i32 = arith.constant 0 : i32
    %2 = arith.cmpi eq, %arg2, %c0_i32 : i32
    %3 = arith.extui %2 : i1 to i32
    %c0_i32_0 = arith.constant 0 : i32
    %4 = arith.cmpi ne, %3, %c0_i32_0 : i32
    scf.if %4 {
      %cst_22 = arith.constant 0xFF800000 : f32
      %40 = vector.broadcast %cst_22 : f32 to vector<128x1xf32>
      %c0_23 = arith.constant 0 : index
      %c0_24 = arith.constant 0 : index
      %41 = vector.load %arg12[%c0_23, %c0_24] : memref<128x1xf32, #tpu.memory_space<vmem>>, vector<128x1xf32>
      tpu.vector_store %arg12[%c0_23, %c0_24], %40 {strides = array<i32>} : memref<128x1xf32, #tpu.memory_space<vmem>>, vector<128x1xf32>,
      %cst_25 = arith.constant 0.000000e+00 : f32
      %42 = vector.broadcast %cst_25 : f32 to vector<128x1xf32>
      %c0_26 = arith.constant 0 : index
      %c0_27 = arith.constant 0 : index
      %43 = vector.load %arg13[%c0_26, %c0_27] : memref<128x1xf32, #tpu.memory_space<vmem>>, vector<128x1xf32>
      tpu.vector_store %arg13[%c0_26, %c0_27], %42 {strides = array<i32>} : memref<128x1xf32, #tpu.memory_space<vmem>>, vector<128x1xf32>,
      %cst_28 = arith.constant 0.000000e+00 : f32
      %44 = vector.broadcast %cst_28 : f32 to vector<128x128xf32>
      %c0_29 = arith.constant 0 : index
      %c0_30 = arith.constant 0 : index
      %45 = vector.load %arg14[%c0_29, %c0_30] : memref<128x128xf32, #tpu.memory_space<vmem>>, vector<128x128xf32>
      tpu.vector_store %arg14[%c0_29, %c0_30], %44 {strides = array<i32>} : memref<128x128xf32, #tpu.memory_space<vmem>>, vector<128x128xf32>,
      %c0_31 = arith.constant 0 : index
      %c0_32 = arith.constant 0 : index
      %c0_33 = arith.constant 0 : index
      %46 = vector.load %arg4[%c0_31, %c0_32, %c0_33] : memref<1x128x128xf32, #tpu.memory_space<vmem>>, vector<1x128x128xf32>
      %47 = vector.shape_cast %46 : vector<1x128x128xf32> to vector<128x128xf32>
      %48 = arith.truncf %47 : vector<128x128xf32> to vector<128x128xbf16>
      %c0_34 = arith.constant 0 : index
      %c0_35 = arith.constant 0 : index
      %49 = vector.load %arg6[%c0_34, %c0_35] : memref<128x128xbf16, #tpu.memory_space<vmem>>, vector<128x128xbf16>
      %cst_36 = arith.constant dense<0.000000e+00> : vector<128x128xf32>
      %50 = tpu.matmul %48, %49, %cst_36 {dimension_numbers = #tpu.dot_dimension_numbers<[1], [0], [0], [1], [0, 0, 1, 1], [], []>} : vector<128x128xbf16>, vector<128x128xbf16>, vector<128x128xf32> -> vector<128x128xf32>
      %c0_37 = arith.constant 0 : index
      %c0_38 = arith.constant 0 : index
      %51 = vector.load %arg7[%c0_37, %c0_38] : memref<1x128xf32, #tpu.memory_space<vmem>>, vector<1x128xf32>
      %52 = vector.broadcast %51 : vector<1x128xf32> to vector<128x128xf32>
      %53 = arith.addf %50, %52 : vector<128x128xf32>
      %54 = arith.truncf %53 : vector<128x128xf32> to vector<128x128xbf16>
      %c0_39 = arith.constant 0 : index
      %c0_40 = arith.constant 0 : index
      %55 = vector.load %arg11[%c0_39, %c0_40] : memref<128x128xbf16, #tpu.memory_space<vmem>>, vector<128x128xbf16>
      tpu.vector_store %arg11[%c0_39, %c0_40], %54 {strides = array<i32>} : memref<128x128xbf16, #tpu.memory_space<vmem>>, vector<128x128xbf16>,
    } else {
    }
    %c0_i32_1 = arith.constant 0 : i32
    %5 = arith.cmpi eq, %arg1, %c0_i32_1 : i32
    %6 = arith.extui %5 : i1 to i32
    %c0_i32_2 = arith.constant 0 : i32
    %7 = arith.cmpi ne, %6, %c0_i32_2 : i32
    scf.if %7 {
      %c0_22 = arith.constant 0 : index
      %c0_23 = arith.constant 0 : index
      %c0_24 = arith.constant 0 : index
      %40 = vector.load %arg5[%c0_22, %c0_23, %c0_24] : memref<1x128x128xf32, #tpu.memory_space<vmem>>, vector<1x128x128xf32>
      %41 = vector.shape_cast %40 : vector<1x128x128xf32> to vector<128x128xf32>
      %42 = arith.truncf %41 : vector<128x128xf32> to vector<128x128xbf16>
      %c0_25 = arith.constant 0 : index
      %c0_26 = arith.constant 0 : index
      %43 = vector.load %arg8[%c0_25, %c0_26] : memref<128x256xbf16, #tpu.memory_space<vmem>>, vector<128x256xbf16>
      %cst_27 = arith.constant dense<0.000000e+00> : vector<128x256xf32>
      %44 = tpu.matmul %42, %43, %cst_27 {dimension_numbers = #tpu.dot_dimension_numbers<[1], [0], [0], [1], [0, 0, 1, 1], [], []>} : vector<128x128xbf16>, vector<128x256xbf16>, vector<128x256xf32> -> vector<128x256xf32>
      %c0_28 = arith.constant 0 : index
      %c0_29 = arith.constant 0 : index
      %45 = vector.load %arg9[%c0_28, %c0_29] : memref<1x256xf32, #tpu.memory_space<vmem>>, vector<1x256xf32>
      %46 = vector.broadcast %45 : vector<1x256xf32> to vector<128x256xf32>
      %47 = arith.addf %44, %46 : vector<128x256xf32>
      %48 = vector.extract_strided_slice %47 {offsets = [0, 0], sizes = [128, 128], strides = [1, 1]} : vector<128x256xf32> to vector<128x128xf32>
      %49 = arith.truncf %48 : vector<128x128xf32> to vector<128x128xbf16>
      %50 = arith.index_cast %1 : i32 to index
      %c0_30 = arith.constant 0 : index
      %51 = vector.load %arg15[%50, %c0_30] : memref<256x128xbf16, #tpu.memory_space<vmem>>, vector<128x128xbf16>
      tpu.vector_store %arg15[%50, %c0_30], %49 {strides = array<i32>} : memref<256x128xbf16, #tpu.memory_space<vmem>>, vector<128x128xbf16>,
      %52 = vector.extract_strided_slice %47 {offsets = [0, 128], sizes = [128, 128], strides = [1, 1]} : vector<128x256xf32> to vector<128x128xf32>
      %53 = arith.truncf %52 : vector<128x128xf32> to vector<128x128xbf16>
      %54 = arith.index_cast %1 : i32 to index
      %c0_31 = arith.constant 0 : index
      %55 = vector.load %arg16[%54, %c0_31] : memref<256x128xbf16, #tpu.memory_space<vmem>>, vector<128x128xbf16>
      tpu.vector_store %arg16[%54, %c0_31], %53 {strides = array<i32>} : memref<256x128xbf16, #tpu.memory_space<vmem>>, vector<128x128xbf16>,
    } else {
    }
    %8 = arith.index_cast %1 : i32 to index
    %c0 = arith.constant 0 : index
    %9 = vector.load %arg15[%8, %c0] : memref<256x128xbf16, #tpu.memory_space<vmem>>, vector<128x128xbf16>
    %10 = arith.index_cast %1 : i32 to index
    %c0_3 = arith.constant 0 : index
    %11 = vector.load %arg16[%10, %c0_3] : memref<256x128xbf16, #tpu.memory_space<vmem>>, vector<128x128xbf16>
    %c0_4 = arith.constant 0 : index
    %c0_5 = arith.constant 0 : index
    %12 = vector.load %arg11[%c0_4, %c0_5] : memref<128x128xbf16, #tpu.memory_space<vmem>>, vector<128x128xbf16>
    %cst = arith.constant dense<0.000000e+00> : vector<128x128xf32>
    %13 = tpu.matmul %12, %9, %cst {dimension_numbers = #tpu.dot_dimension_numbers<[1], [1], [0], [0], [0, 0, 1, 0], [], []>} : vector<128x128xbf16>, vector<128x128xbf16>, vector<128x128xf32> -> vector<128x128xf32>
    %c0_6 = arith.constant 0 : index
    %c0_7 = arith.constant 0 : index
    %14 = vector.load %arg12[%c0_6, %c0_7] : memref<128x1xf32, #tpu.memory_space<vmem>>, vector<128x1xf32>
    %cst_8 = arith.constant dense<0xFF800000> : vector<128xf32>
    %15 = vector.multi_reduction <maximumf>, %13, %cst_8 [1] : vector<128x128xf32> to vector<128xf32>
    %16 = vector.shape_cast %15 : vector<128xf32> to vector<128x1xf32>
    %17 = arith.maximumf %14, %16 : vector<128x1xf32>
    %18 = arith.subf %14, %17 : vector<128x1xf32>
    %19 = math.exp %18 : vector<128x1xf32>
    %20 = vector.broadcast %17 : vector<128x1xf32> to vector<128x128xf32>
    %21 = arith.subf %13, %20 : vector<128x128xf32>
    %22 = math.exp %21 : vector<128x128xf32>
    %c0_9 = arith.constant 0 : index
    %c0_10 = arith.constant 0 : index
    %23 = vector.load %arg13[%c0_9, %c0_10] : memref<128x1xf32, #tpu.memory_space<vmem>>, vector<128x1xf32>
    %24 = arith.mulf %19, %23 : vector<128x1xf32>
    %cst_11 = arith.constant dense<0.000000e+00> : vector<128xf32>
    %25 = vector.multi_reduction <add>, %22, %cst_11 [1] : vector<128x128xf32> to vector<128xf32>
    %26 = vector.shape_cast %25 : vector<128xf32> to vector<128x1xf32>
    %27 = arith.addf %24, %26 : vector<128x1xf32>
    %c0_12 = arith.constant 0 : index
    %c0_13 = arith.constant 0 : index
    %28 = vector.load %arg13[%c0_12, %c0_13] : memref<128x1xf32, #tpu.memory_space<vmem>>, vector<128x1xf32>
    tpu.vector_store %arg13[%c0_12, %c0_13], %27 {strides = array<i32>} : memref<128x1xf32, #tpu.memory_space<vmem>>, vector<128x1xf32>,
    %c0_14 = arith.constant 0 : index
    %c0_15 = arith.constant 0 : index
    %29 = vector.load %arg14[%c0_14, %c0_15] : memref<128x128xf32, #tpu.memory_space<vmem>>, vector<128x128xf32>
    %30 = vector.broadcast %19 : vector<128x1xf32> to vector<128x128xf32>
    %31 = arith.mulf %30, %29 : vector<128x128xf32>
    %32 = arith.truncf %22 : vector<128x128xf32> to vector<128x128xbf16>
    %cst_16 = arith.constant dense<0.000000e+00> : vector<128x128xf32>
    %33 = tpu.matmul %32, %11, %cst_16 {dimension_numbers = #tpu.dot_dimension_numbers<[1], [0], [0], [1], [0, 0, 1, 1], [], []>} : vector<128x128xbf16>, vector<128x128xbf16>, vector<128x128xf32> -> vector<128x128xf32>
    %34 = arith.addf %31, %33 : vector<128x128xf32>
    %c0_17 = arith.constant 0 : index
    %c0_18 = arith.constant 0 : index
    %35 = vector.load %arg14[%c0_17, %c0_18] : memref<128x128xf32, #tpu.memory_space<vmem>>, vector<128x128xf32>
    tpu.vector_store %arg14[%c0_17, %c0_18], %34 {strides = array<i32>} : memref<128x128xf32, #tpu.memory_space<vmem>>, vector<128x128xf32>,
    %c0_19 = arith.constant 0 : index
    %c0_20 = arith.constant 0 : index
    %36 = vector.load %arg12[%c0_19, %c0_20] : memref<128x1xf32, #tpu.memory_space<vmem>>, vector<128x1xf32>
    tpu.vector_store %arg12[%c0_19, %c0_20], %17 {strides = array<i32>} : memref<128x1xf32, #tpu.memory_space<vmem>>, vector<128x1xf32>,
    %c1_i32 = arith.constant 1 : i32
    %37 = arith.cmpi eq, %arg2, %c1_i32 : i32
    %38 = arith.extui %37 : i1 to i32
    %c0_i32_21 = arith.constant 0 : i32
    %39 = arith.cmpi ne, %38, %c0_i32_21 : i32
    scf.if %39 {
      %c0_22 = arith.constant 0 : index
      %c0_23 = arith.constant 0 : index
      %40 = vector.load %arg13[%c0_22, %c0_23] : memref<128x1xf32, #tpu.memory_space<vmem>>, vector<128x1xf32>
      %41 = tpu.reciprocal %40 {approx = true} : vector<128x1xf32> -> vector<128x1xf32>
      %c0_24 = arith.constant 0 : index
      %c0_25 = arith.constant 0 : index
      %42 = vector.load %arg14[%c0_24, %c0_25] : memref<128x128xf32, #tpu.memory_space<vmem>>, vector<128x128xf32>
      %43 = vector.broadcast %41 : vector<128x1xf32> to vector<128x128xf32>
      %44 = arith.mulf %42, %43 : vector<128x128xf32>
      %c0_26 = arith.constant 0 : index
      %45 = memref.load %arg3[%c0_26] : memref<1xf32, #tpu.memory_space<smem>>
      %46 = vector.broadcast %45 : f32 to vector<128x128xf32>
      %47 = arith.mulf %46, %44 : vector<128x128xf32>
      %c0_27 = arith.constant 0 : index
      %c0_28 = arith.constant 0 : index
      %c0_29 = arith.constant 0 : index
      %48 = vector.load %arg4[%c0_27, %c0_28, %c0_29] : memref<1x128x128xf32, #tpu.memory_space<vmem>>, vector<1x128x128xf32>
      %49 = vector.shape_cast %48 : vector<1x128x128xf32> to vector<128x128xf32>
      %50 = arith.addf %47, %49 : vector<128x128xf32>
      %c0_30 = arith.constant 0 : index
      %c0_31 = arith.constant 0 : index
      %c0_32 = arith.constant 0 : index
      %51 = vector.load %arg10[%c0_30, %c0_31, %c0_32] : memref<1x128x128xf32, #tpu.memory_space<vmem>>, vector<1x128x128xf32>
      %52 = vector.shape_cast %51 : vector<1x128x128xf32> to vector<128x128xf32>
      %53 = vector.shape_cast %50 : vector<128x128xf32> to vector<1x128x128xf32>
      tpu.vector_store %arg10[%c0_30, %c0_31, %c0_32], %53 {strides = array<i32>} : memref<1x128x128xf32, #tpu.memory_space<vmem>>, vector<1x128x128xf32>,
    } else {
    }
    return
  }
  func.func @transform_0(%arg0: i32, %arg1: i32, %arg2: i32) -> i32 {
    %c0_i32 = arith.constant 0 : i32
    %c0_i32_0 = arith.constant 0 : i32
    return %c0_i32 : i32
  }
  func.func @transform_1(%arg0: i32, %arg1: i32, %arg2: i32) -> (i32, i32, i32) {
    %c0_i32 = arith.constant 0 : i32
    %c0_i32_0 = arith.constant 0 : i32
    return %arg0, %arg1, %c0_i32 : i32, i32, i32
  }
  func.func @transform_2(%arg0: i32, %arg1: i32, %arg2: i32) -> (i32, i32, i32) {
    %c0_i32 = arith.constant 0 : i32
    %0 = arith.cmpi eq, %arg1, %c0_i32 : i32
    %c0_i32_0 = arith.constant 0 : i32
    %1 = arith.select %0, %arg2, %c0_i32_0 : i32
    %c0_i32_1 = arith.constant 0 : i32
    %c0_i32_2 = arith.constant 0 : i32
    return %arg0, %1, %c0_i32_1 : i32, i32, i32
  }
  func.func @transform_3(%arg0: i32, %arg1: i32, %arg2: i32) -> (i32, i32) {
    %c0_i32 = arith.constant 0 : i32
    %c0_i32_0 = arith.constant 0 : i32
    %c0_i32_1 = arith.constant 0 : i32
    return %c0_i32, %c0_i32_0 : i32, i32
  }
  func.func @transform_4(%arg0: i32, %arg1: i32, %arg2: i32) -> (i32, i32) {
    %c0_i32 = arith.constant 0 : i32
    %c0_i32_0 = arith.constant 0 : i32
    %c0_i32_1 = arith.constant 0 : i32
    return %c0_i32, %c0_i32_0 : i32, i32
  }
  func.func @transform_5(%arg0: i32, %arg1: i32, %arg2: i32) -> (i32, i32) {
    %c0_i32 = arith.constant 0 : i32
    %c0_i32_0 = arith.constant 0 : i32
    %c0_i32_1 = arith.constant 0 : i32
    return %c0_i32, %c0_i32_0 : i32, i32
  }
  func.func @transform_6(%arg0: i32, %arg1: i32, %arg2: i32) -> (i32, i32) {
    %c0_i32 = arith.constant 0 : i32
    %c0_i32_0 = arith.constant 0 : i32
    %c0_i32_1 = arith.constant 0 : i32
    return %c0_i32, %c0_i32_0 : i32, i32
  }
  func.func @transform_7(%arg0: i32, %arg1: i32, %arg2: i32) -> (i32, i32, i32) {
    %c0_i32 = arith.constant 0 : i32
    %c0_i32_0 = arith.constant 0 : i32
    return %arg0, %arg1, %c0_i32 : i32, i32, i32
  }
}

</mosaic_0001>

<bundles_post_ra>
// kernel: self_attention.1
= control target key start
LH: loop header
LB: loop body
LE: loop exit
PB: predicated region body
PF: predicated region fallthrough
CT: control target
= control target key end

     0   :  { %s3408_s0 = inlined_call_operand.<no memory space> [shape: f32[1], index: 0, kind: input, shape index: {}]   ;;  %s3409_s1 = inlined_call_operand.vmem [shape: f32[2,256,128], index: 1, kind: input, shape index: {}, may-alias: {1,2}]   ;;  %s3410_s2 = inlined_call_operand.vmem [shape: f32[2,256,128], index: 2, kind: input, shape index: {}, may-alias: {1,2}]   ;;  %s3411_s3 = inlined_call_operand.vmem [shape: bf16[128,128], index: 3, kind: input, shape index: {}]   ;;  %s3412_s4 = inlined_call_operand.vmem [shape: f32[1,128], index: 4, kind: input, shape index: {}]   ;;  %s3413_s5 = inlined_call_operand.vmem [shape: bf16[128,256], index: 5, kind: input, shape index: {}]   ;;  %s3414_s6 = inlined_call_operand.vmem [shape: f32[1,256], index: 6, kind: input, shape index: {}]   ;;  %s3415_s7 = inlined_call_operand.hbm [shape: f32[2,256,128], index: 7, kind: output, shape index: {}]  }
   0x1   :  { %12 = sst [smem:[#allocation8]] %s3408_s0 }
   0x2   :  { %13 = vsyncpa [#allocation10], 0 }
   0x3   :  { %15 = vsyncpa [#allocation10 + $0x1], 0  ;;  %s2605_s26 = smov 0   ;;  %s2607_s27 = smov 0  }
   0x4   :  { %s2609_s28 = smov 0   ;;  %s2611_s29 = smov 0  }
   0x5   :  { %s2613_s30 = smov 0   ;;  %s2615_s8 = smov 0  }
   0x6   :  { %s2617_s9 = smov 0   ;;  %s2619_s10 = smov 0  }
   0x7   :  { %s2621_s11 = smov 0   ;;  %s2623_s0 = smov 0  }
   0x8 LB: > { %3425 = sst [smem:[#allocation12_spill]] %s2516_s26  ;;  %s1989_s12 = sadd.s32 4294967295, %s2552_s0   ;;  %s2552_s0 = sphi %s2623_s0, %s21_s0   ;;  %s2548_s11 = sphi %s2621_s11, %s3447_s11   ;;  %s2544_s10 = sphi %s2619_s10, %s3446_s10   ;;  %s2540_s9 = sphi %s2617_s9, %s3445_s9   ;;  %s2536_s8 = sphi %s2615_s8, %s3444_s8   ;;  %s2532_s30 = sphi %s2613_s30, %s3443_s30   ;;  %s2528_s29 = sphi %s2611_s29, %s3442_s29   ;;  %s2524_s28 = sphi %s2609_s28, %s3441_s28   ;;  %s2520_s27 = sphi %s2607_s27, %s3449_s27   ;;  %s2516_s26 = sphi %s2605_s26, %s3448_s26  }
   0x9   : > { %3426 = sst [smem:[#allocation13_spill]] %s2524_s28  ;;  %s1990_s13 = sadd.s32 4294967294, %s2552_s0  }
   0xa   : > { %3427 = sst [smem:[#allocation14_spill]] %s2540_s9  ;;  %s33_s14 = sadd.s32 1, %s2540_s9 }
   0xb   : > { %3428 = sst [smem:[#allocation15_spill]] %s2544_s10  ;;  %p34_p0 = scmp.ge.s32.totalorder %s33_s14, 2 }
   0xc   : > { %3429 = sst [smem:[#allocation16_spill]] %s2548_s11  ;;  %s36_s15 = sadd.s32 1, %s2544_s10 }
   0xd   : > { %s40_s16 = sadd.s32 1, %s2548_s11  ;;  %p224_p1 = scmp.ne.s32.totalorder %s2524_s28, %s2520_s27 }
   0xe   : > { %s3451_s14 = smov (%p34_p0, %s33_s14), 0  ;;  %s3453_s15 = smov (!%p34_p0, %s36_s15), %s2544_s10 }
   0xf   : > { %3430 = sst [smem:[#allocation17_spill]] %s3451_s14  ;;  %p225_p2 = scmp.eq.s32.totalorder %s1989_s12, 7 }
  0x10   : > { %p230_p3 = scmp.ne.s32.totalorder %s2520_s27, %s2516_s26  ;;  %p38_p4 = scmp.ge.s32.totalorder %s3453_s15, 2 }
  0x11   : > { %p231_p5 = scmp.eq.s32.totalorder %s1990_s13, 7  ;;  %p2667_p6 = por %p225_p2, %p224_p1 }
  0x12   : > { %s3455_s15 = smov (%p38_p4, %s3453_s15), 0  ;;  %s3457_s16 = smov (!%p38_p4, %s40_s16), %s2548_s11 }
  0x13   : > { %3432 = sst [smem:[#allocation18_spill]] %s3455_s15  ;;  %p2674_p7 = por %p231_p5, %p230_p3 }
  0x14   : > { %p1993_p8 = scmp.ge.s32.totalorder %s2552_s0, 1  ;;  %p42_p9 = scmp.ge.s32.totalorder %s3457_s16, 2 }
  0x15   : > { %s3433_s18 = scalar_select %p2674_p7, 1, 0 }
  0x16   : > { %p294_p10 = scmp.lt.s32.totalorder %s2552_s0, 9  ;;  %s210_s19 = ssub.s32 %s2544_s10, %s3455_s15 }
  0x17   : > { %3434 = sst [smem:[#allocation19_spill]] %s3433_s18  ;;  %s3459_s16 = smov (%p42_p9, %s3457_s16), 0 }
  0x18   : > { %3435 = sst [smem:[#allocation20_spill]] %s3459_s16  ;;  %p295_p11 = pnand %p1993_p8, %p294_p10 }
  0x19   : > { %s209_s20 = ssub.s32 %s2548_s11, %s3459_s16  ;;  %s214_s22 = sadd.s32 1, %s2524_s28 }
  0x1a   : > { %s211_s21 = sor.u32 %s210_s19, %s209_s20  ;;  %298 = sbr.rel (%p295_p11) target bundleno = 1570 (0x622), region = 48 }
  0x1b   : > { %p212_p12 = scmp.eq.s32.totalorder %s211_s21, 0  ;;  %s3421_s24 = sand.u32 (!%p295_p11), 1, %s2520_s27  }
  0x1c   : > { %s2692_s25 = sshll.u32 (!%p295_p11), %s2532_s30, 4  ;;  %s1994_s12 = sshll.u32 (!%p295_p11), %s3421_s24, 7 }
  0x1d   : > { %s2688_s23 = scalar_select %p212_p12, %s2524_s28, %s214_s22  }
  0x1e   : > { %p342_p13 = scmp.lt.s32.totalorder (!%p295_p11), %s2536_s8, 1  ;;  %p344_p0 = scmp.lt.s32.totalorder (!%p295_p11), %s2692_s25, 31 }
  0x1f   : > { %3436 = sst [smem:[#allocation21_spill]] %s2688_s23  ;;  %p351_p1 = scmp.eq.s32.totalorder (!%p295_p11), %s2532_s30, 0 }
  0x20   : > { %s2001_s22 = sshll.u32 (!%p295_p11), %s2528_s29, 7  ;;  %p2002_p3 = scmp.ne.s32.totalorder (!%p295_p11), %s2528_s29, 0 }
  0x21   : > { %s343_s13 = scalar_select %p342_p13, %s2536_s8, 1 }
  0x22   : > { %s345_s19 = scalar_select %p344_p0, %s2692_s25, 31 }
  0x23   : > { %s1996_s20 = sshll.u32 %s343_s13, 5  ;;  %s2713_s13 = scalar_lea.vmem [#allocation9], %s1994_s12  ;;  %vm372_vm0 = vcmask (!%p2002_p3), 7168   ;;  %v2310_v0 = vld [vmem:[%s3411_s3] sm:$0xff] (!%p2002_p3)   ;;  %v2554_v1 = vmov (!%p2002_p3), -inf   ;;  %v2555_v2 = vmov (!%p2002_p3), 0.0  }
  0x24   : > { %s347_s21 = sadd.s32 %s1996_s20, %s345_s19  ;;  %373 = vst.msk [vmem:[#allocation3] sm:$0xff] (!%p2002_p3), %vm372_vm0, %v2554_v1  ;;  %374 = vst.msk [vmem:[#allocation3 + $0x8] sm:$0xff] (!%p2002_p3), %vm372_vm0, %v2554_v1  ;;  %2088 = vmatprep.subr.bf16.mxu0 (!%p2002_p3), %v2310_v0  ;;  %2184 = vmatprep.subr.bf16.mxu1 (!%p2002_p3), %v2310_v0  ;;  %v2311_v3 = vld [vmem:[%s3411_s3 + $0x8] sm:$0xff] (!%p2002_p3)   ;;  %v2312_v4 = vld [vmem:[%s3411_s3 + $0x10] sm:$0xff] (!%p2002_p3)  }
  0x25   : > { %s1997_s16 = sshll.u32 %s347_s21, 3  ;;  %375 = vst.msk [vmem:[#allocation3 + $0x10] sm:$0xff] (!%p2002_p3), %vm372_vm0, %v2554_v1  ;;  %376 = vst.msk [vmem:[#allocation3 + $0x18] sm:$0xff] (!%p2002_p3), %vm372_vm0, %v2554_v1  ;;  %2089 = vmatpush3.bf16.msra.mxu0 (!%p2002_p3), %v2310_v0  ;;  %2192 = vmatpush3.bf16.msra.mxu1 (!%p2002_p3), %v2310_v0  ;;  %v2313_v5 = vld [vmem:[%s3411_s3 + $0x18] sm:$0xff] (!%p2002_p3)   ;;  %v2314_v12 = vld [vmem:[%s3411_s3 + $0x20] sm:$0xff] (!%p2002_p3)  }
  0x26   : > { %s2705_s11 = scalar_lea.vmem %s3409_s1, %s1997_s16  ;;  %377 = vst.msk [vmem:[#allocation3 + $0x20] sm:$0xff] (!%p2002_p3), %vm372_vm0, %v2554_v1  ;;  %378 = vst.msk [vmem:[#allocation3 + $0x28] sm:$0xff] (!%p2002_p3), %vm372_vm0, %v2554_v1  ;;  %2090 = vmatprep.subr.bf16.mxu0 (!%p2002_p3), %v2311_v3  ;;  %2185 = vmatprep.subr.bf16.mxu1 (!%p2002_p3), %v2311_v3  ;;  %v2315_v13 = vld [vmem:[%s3411_s3 + $0x28] sm:$0xff] (!%p2002_p3)   ;;  %v2316_v14 = vld [vmem:[%s3411_s3 + $0x30] sm:$0xff] (!%p2002_p3)  }
  0x27   : > { %s352_s10 = scalar_select %p351_p1, %s2528_s29, 0 }
  0x28   : > { %379 = vst.msk [vmem:[#allocation3 + $0x30] sm:$0xff] (!%p2002_p3), %vm372_vm0, %v2554_v1  ;;  %380 = vst.msk [vmem:[#allocation3 + $0x38] sm:$0xff] (!%p2002_p3), %vm372_vm0, %v2554_v1  ;;  %v421_v6 = vld [vmem:[%s2705_s11] sm:$0xff] (!%p2002_p3)  ;;  %v422_v7 = vld [vmem:[%s2705_s11 + $0x8] sm:$0xff] (!%p2002_p3) }
  0x29   : > { %s1998_s9 = sshll.u32 %s352_s10, 4  ;;  %371 = sbr.rel (%p2002_p3) target bundleno = 296 (0x128), region = 52  ;;  %381 = vst.msk [vmem:[#allocation3 + $0x40] sm:$0xff] (!%p2002_p3), %vm372_vm0, %v2554_v1  ;;  %382 = vst.msk [vmem:[#allocation3 + $0x48] sm:$0xff] (!%p2002_p3), %vm372_vm0, %v2554_v1  ;;  %2091 = vmatpush3.bf16.msra.mxu0 (!%p2002_p3), %v2311_v3  ;;  %2193 = vmatpush3.bf16.msra.mxu1 (!%p2002_p3), %v2311_v3  ;;  %v437_v8 = vpack.c.bf16 (!%p2002_p3), %v422_v7, %v421_v6  ;;  %v429_v9 = vld [vmem:[%s2705_s11 + $0x40] sm:$0xff] (!%p2002_p3)  ;;  %v430_v10 = vld [vmem:[%s2705_s11 + $0x48] sm:$0xff] (!%p2002_p3) }
  0x2a   : > { %p356_p2 = scmp.lt.s32.totalorder %s1998_s9, 31  ;;  %383 = vst.msk [vmem:[#allocation3 + $0x50] sm:$0xff] (!%p2002_p3), %vm372_vm0, %v2554_v1  ;;  %384 = vst.msk [vmem:[#allocation3 + $0x58] sm:$0xff] (!%p2002_p3), %vm372_vm0, %v2554_v1  ;;  %2092 = vmatprep.subr.bf16.mxu0 (!%p2002_p3), %v2312_v4  ;;  %2186 = vmatprep.subr.bf16.mxu1 (!%p2002_p3), %v2312_v4  ;;  %v441_v11 = vpack.c.bf16 (!%p2002_p3), %v430_v10, %v429_v9  ;;  %v2317_v15 = vld [vmem:[%s3411_s3 + $0x38] sm:$0xff] (!%p2002_p3)   ;;  %v423_v16 = vld [vmem:[%s2705_s11 + $0x10] sm:$0xff] (!%p2002_p3) }
  0x2b   : > { %385 = vst.msk [vmem:[#allocation3 + $0x60] sm:$0xff] (!%p2002_p3), %vm372_vm0, %v2554_v1  ;;  %386 = vst.msk [vmem:[#allocation3 + $0x68] sm:$0xff] (!%p2002_p3), %vm372_vm0, %v2554_v1  ;;  %2104 = vmatprep.mubr.bf16.mxu0 (!%p2002_p3), %v437_v8  ;;  %v424_v17 = vld [vmem:[%s2705_s11 + $0x18] sm:$0xff] (!%p2002_p3)  ;;  %v431_v18 = vld [vmem:[%s2705_s11 + $0x50] sm:$0xff] (!%p2002_p3) }
  0x2c   : > { %s3461_s9 = smov (!%p356_p2, %s1998_s9), 31  ;;  %387 = vst.msk [vmem:[#allocation3 + $0x70] sm:$0xff] (!%p2002_p3), %vm372_vm0, %v2554_v1  ;;  %388 = vst.msk [vmem:[#allocation3 + $0x78] sm:$0xff] (!%p2002_p3), %vm372_vm0, %v2554_v1  ;;  %2112 = vmatprep.mubr.bf16.mxu1 (!%p2002_p3), %v441_v11  ;;  %v432_v19 = vld [vmem:[%s2705_s11 + $0x58] sm:$0xff] (!%p2002_p3)  ;;  %v425_v20 = vld [vmem:[%s2705_s11 + $0x20] sm:$0xff] (!%p2002_p3)  ;;  %v438_v24 = vpack.c.bf16 (!%p2002_p3), %v424_v17, %v423_v16 }
  0x2d   : > { %s359_s23 = sadd.s32 %s1996_s20, %s3461_s9  ;;  %389 = vst.msk [vmem:[#allocation4] sm:$0xff] (!%p2002_p3), %vm372_vm0, %v2555_v2  ;;  %390 = vst.msk [vmem:[#allocation4 + $0x8] sm:$0xff] (!%p2002_p3), %vm372_vm0, %v2555_v2  ;;  %2093 = vmatpush3.bf16.msra.mxu0 (!%p2002_p3), %v2312_v4  ;;  %2194 = vmatpush3.bf16.msra.mxu1 (!%p2002_p3), %v2312_v4  ;;  %v426_v21 = vld [vmem:[%s2705_s11 + $0x28] sm:$0xff] (!%p2002_p3)  ;;  %v433_v22 = vld [vmem:[%s2705_s11 + $0x60] sm:$0xff] (!%p2002_p3)  ;;  %v442_v25 = vpack.c.bf16 (!%p2002_p3), %v432_v19, %v431_v18 }
  0x2e   : > { %s2000_s24 = sshll.u32 %s359_s23, 3  ;;  %391 = vst.msk [vmem:[#allocation4 + $0x10] sm:$0xff] (!%p2002_p3), %vm372_vm0, %v2555_v2  ;;  %392 = vst.msk [vmem:[#allocation4 + $0x18] sm:$0xff] (!%p2002_p3), %vm372_vm0, %v2555_v2  ;;  %2094 = vmatprep.subr.bf16.mxu0 (!%p2002_p3), %v2313_v5  ;;  %2187 = vmatprep.subr.bf16.mxu1 (!%p2002_p3), %v2313_v5  ;;  %v434_v23 = vld [vmem:[%s2705_s11 + $0x68] sm:$0xff] (!%p2002_p3)  ;;  %v439_v26 = vpack.c.bf16 (!%p2002_p3), %v426_v21, %v425_v20  ;;  %v427_v28 = vld [vmem:[%s2705_s11 + $0x30] sm:$0xff] (!%p2002_p3) }
  0x2f   : > { %s2711_s26 = scalar_lea.vmem %s3410_s2, %s2000_s24  ;;  %393 = vst.msk [vmem:[#allocation4 + $0x20] sm:$0xff] (!%p2002_p3), %vm372_vm0, %v2555_v2  ;;  %394 = vst.msk [vmem:[#allocation4 + $0x28] sm:$0xff] (!%p2002_p3), %vm372_vm0, %v2555_v2  ;;  %v443_v27 = vpack.c.bf16 (!%p2002_p3), %v434_v23, %v433_v22  ;;  %v428_v29 = vld [vmem:[%s2705_s11 + $0x38] sm:$0xff] (!%p2002_p3)  ;;  %v435_v30 = vld [vmem:[%s2705_s11 + $0x70] sm:$0xff] (!%p2002_p3) }
  0x30   : > { %395 = vst.msk [vmem:[#allocation4 + $0x30] sm:$0xff] %vm372_vm0, %v2555_v2  ;;  %396 = vst.msk [vmem:[#allocation4 + $0x38] sm:$0xff] %vm372_vm0, %v2555_v2  ;;  %v436_v31 = vld [vmem:[%s2705_s11 + $0x78] sm:$0xff]  ;;  %v440_v32 = vpack.c.bf16 %v428_v29, %v427_v28  ;;  %v2003_v35 = vld [vmem:[%s3412_s4] ss:$0 sm:$0xff] }
  0x31   : > { %397 = vst.msk [vmem:[#allocation4 + $0x40] sm:$0xff] %vm372_vm0, %v2555_v2  ;;  %398 = vst.msk [vmem:[#allocation4 + $0x48] sm:$0xff] %vm372_vm0, %v2555_v2  ;;  %2095 = vmatpush3.bf16.msra.mxu0 %v2313_v5  ;;  %2195 = vmatpush3.bf16.msra.mxu1 %v2313_v5  ;;  %v444_v33 = vpack.c.bf16 %v436_v31, %v435_v30 }
  0x32   : > { %399 = vst.msk [vmem:[#allocation4 + $0x50] sm:$0xff] %vm372_vm0, %v2555_v2  ;;  %400 = vst.msk [vmem:[#allocation4 + $0x58] sm:$0xff] %vm372_vm0, %v2555_v2  ;;  %2096 = vmatprep.subr.bf16.mxu0 %v2314_v12  ;;  %2188 = vmatprep.subr.bf16.mxu1 %v2314_v12 }
  0x33   : > { %401 = vst.msk [vmem:[#allocation4 + $0x60] sm:$0xff] %vm372_vm0, %v2555_v2  ;;  %402 = vst.msk [vmem:[#allocation4 + $0x68] sm:$0xff] %vm372_vm0, %v2555_v2 }
  0x34   : > { %403 = vst.msk [vmem:[#allocation4 + $0x70] sm:$0xff] %vm372_vm0, %v2555_v2  ;;  %404 = vst.msk [vmem:[#allocation4 + $0x78] sm:$0xff] %vm372_vm0, %v2555_v2 }
  0x35   : > { %405 = vst [vmem:[#allocation5] sm:$0xff] %v2555_v2  ;;  %406 = vst [vmem:[#allocation5 + $0x8] sm:$0xff] %v2555_v2  ;;  %2097 = vmatpush3.bf16.msra.mxu0 %v2314_v12  ;;  %2196 = vmatpush3.bf16.msra.mxu1 %v2314_v12 }
  0x36   : > { %407 = vst [vmem:[#allocation5 + $0x10] sm:$0xff] %v2555_v2  ;;  %408 = vst [vmem:[#allocation5 + $0x18] sm:$0xff] %v2555_v2  ;;  %2098 = vmatprep.subr.bf16.mxu0 %v2315_v13  ;;  %2189 = vmatprep.subr.bf16.mxu1 %v2315_v13 }
  0x37   : > { %409 = vst [vmem:[#allocation5 + $0x20] sm:$0xff] %v2555_v2  ;;  %410 = vst [vmem:[#allocation5 + $0x28] sm:$0xff] %v2555_v2 }
  0x38   : > { %411 = vst [vmem:[#allocation5 + $0x30] sm:$0xff] %v2555_v2  ;;  %412 = vst [vmem:[#allocation5 + $0x38] sm:$0xff] %v2555_v2 }
  0x39   : > { %413 = vst [vmem:[#allocation5 + $0x40] sm:$0xff] %v2555_v2  ;;  %414 = vst [vmem:[#allocation5 + $0x48] sm:$0xff] %v2555_v2  ;;  %2099 = vmatpush3.bf16.msra.mxu0 %v2315_v13  ;;  %2197 = vmatpush3.bf16.msra.mxu1 %v2315_v13 }
  0x3a   : > { %415 = vst [vmem:[#allocation5 + $0x50] sm:$0xff] %v2555_v2  ;;  %416 = vst [vmem:[#allocation5 + $0x58] sm:$0xff] %v2555_v2  ;;  %2100 = vmatprep.subr.bf16.mxu0 %v2316_v14  ;;  %2190 = vmatprep.subr.bf16.mxu1 %v2316_v14 }
  0x3b   : > { %417 = vst [vmem:[#allocation5 + $0x60] sm:$0xff] %v2555_v2  ;;  %418 = vst [vmem:[#allocation5 + $0x68] sm:$0xff] %v2555_v2 }
  0x3c   : > { %419 = vst [vmem:[#allocation5 + $0x70] sm:$0xff] %v2555_v2  ;;  %420 = vst [vmem:[#allocation5 + $0x78] sm:$0xff] %v2555_v2 }
  0x3d   : > { %2101 = vmatpush3.bf16.msra.mxu0 %v2316_v14  ;;  %2198 = vmatpush3.bf16.msra.mxu1 %v2316_v14 }
  0x3e   : > { %2102 = vmatprep.subr.bf16.mxu0 %v2317_v15  ;;  %2191 = vmatprep.subr.bf16.mxu1 %v2317_v15 }
  0x41   : > { %2103 = vmatpush3.bf16.msra.mxu0 %v2317_v15  ;;  %2199 = vmatpush3.bf16.msra.mxu1 %v2317_v15 }
  0x44   : > { %2105 = vmatmul.mubr.bf16.vlgmr.msra.gmra.mrb[0].mxu0 %v438_v24  ;;  %2113 = vmatmul.mubr.bf16.vlgmr.msra.gmra.mrb[0].mxu1 %v442_v25 }
  0x45   : > { %2108 = vmatprep.mubr.bf16.mxu0 %v439_v26  ;;  %2116 = vmatprep.mubr.bf16.mxu1 %v443_v27 }
  0x4c   : > { %2109 = vmatmul.mubr.bf16.gmra.mrb[4].mxu0 %v440_v32  ;;  %2117 = vmatmul.mubr.bf16.gmra.mrb[4].mxu1 %v444_v33 }
 0x117   : > { %v2106_v34 = vpop.f32.mrb[0].mxu0  ;;  %v2114_v36 = vpop.f32.mrb[0].mxu1 }
 0x118   : > { %v550_v37 = vpop.f32.mrb[1].mxu0  ;;  %v582_v38 = vpop.f32.mrb[1].mxu1  ;;  %v559_v41 = vadd.f32 %v2106_v34, %v2003_v35  ;;  %v591_v42 = vadd.f32 %v2114_v36, %v2003_v35 }
 0x119   : > { %v2107_v39 = vpop.f32.mrb[2].mxu0  ;;  %v2115_v40 = vpop.f32.mrb[2].mxu1  ;;  %v551_v47 = vadd.f32 %v2003_v35, %v550_v37  ;;  %v583_v48 = vadd.f32 %v2003_v35, %v582_v38 }
 0x11a   : > { %v562_v43 = vadd.f32 %v2107_v39, %v2003_v35  ;;  %v594_v44 = vadd.f32 %v2115_v40, %v2003_v35  ;;  %v553_v45 = vpop.f32.mrb[3].mxu0  ;;  %v585_v46 = vpop.f32.mrb[3].mxu1 }
 0x11b   : > { %v554_v49 = vadd.f32 %v2003_v35, %v553_v45  ;;  %v586_v50 = vadd.f32 %v2003_v35, %v585_v46 }
 0x11c   : > { %v614_v51 = vpack.c.bf16 %v562_v43, %v559_v41  ;;  %v618_v52 = vpack.c.bf16 %v594_v44, %v591_v42 }
 0x11d   : > { %v613_v53 = vpack.c.bf16 %v554_v49, %v551_v47  ;;  %v617_v54 = vpack.c.bf16 %v586_v50, %v583_v48 }
 0x11e   : > { %622 = vst [vmem:[#allocation2 + $0x8] sm:$0xff] %v614_v51  ;;  %626 = vst [vmem:[#allocation2 + $0x28] sm:$0xff] %v618_v52 }
 0x11f   : > { %621 = vst [vmem:[#allocation2] sm:$0xff] %v613_v53  ;;  %625 = vst [vmem:[#allocation2 + $0x20] sm:$0xff] %v617_v54  ;;  %v2110_v55 = vpop.f32.mrb[4].mxu0  ;;  %v2118_v56 = vpop.f32.mrb[4].mxu1 }
 0x120   : > { %v566_v57 = vpop.f32.mrb[5].mxu0  ;;  %v598_v58 = vpop.f32.mrb[5].mxu1  ;;  %v575_v61 = vadd.f32 %v2110_v55, %v2003_v35  ;;  %v607_v62 = vadd.f32 %v2118_v56, %v2003_v35 }
 0x121   : > { %v2111_v59 = vpop.f32.mrb[6].mxu0  ;;  %v2119_v60 = vpop.f32.mrb[6].mxu1  ;;  %v567_v3 = vadd.f32 %v2003_v35, %v566_v57  ;;  %v599_v4 = vadd.f32 %v2003_v35, %v598_v58 }
 0x122   : > { %v578_v63 = vadd.f32 %v2111_v59, %v2003_v35  ;;  %v610_v0 = vadd.f32 %v2119_v60, %v2003_v35  ;;  %v569_v1 = vpop.f32.mrb[7].mxu0  ;;  %v601_v2 = vpop.f32.mrb[7].mxu1 }
 0x123   : > { %v570_v5 = vadd.f32 %v2003_v35, %v569_v1  ;;  %v602_v6 = vadd.f32 %v2003_v35, %v601_v2 }
 0x124   : > { %v616_v7 = vpack.c.bf16 %v578_v63, %v575_v61  ;;  %v620_v8 = vpack.c.bf16 %v610_v0, %v607_v62 }
 0x125   : > { %v615_v9 = vpack.c.bf16 %v570_v5, %v567_v3  ;;  %v619_v10 = vpack.c.bf16 %v602_v6, %v599_v4 }
 0x126   : > { %624 = vst [vmem:[#allocation2 + $0x18] sm:$0xff] %v616_v7  ;;  %628 = vst [vmem:[#allocation2 + $0x38] sm:$0xff] %v620_v8 }
 0x127   : > { %623 = vst [vmem:[#allocation2 + $0x10] sm:$0xff] %v615_v9  ;;  %627 = vst [vmem:[#allocation2 + $0x30] sm:$0xff] %v619_v10 }
 0x128 PF: > { %p2012_p4 = scmp.ne.s32.totalorder %s2532_s30, 0 }
 0x129   : > { %v2318_v11 = vld [vmem:[%s3413_s5 + $0x4] ss:$8 sps:$4 sm:$0xff] (!%p2012_p4)   ;;  %v2320_v12 = vld [vmem:[%s3413_s5] ss:$8 sps:$4 sm:$0xff] (!%p2012_p4)   ;;  %v2556_v13 = vmov (!%p2012_p4), 0   ;;  %v635_v34 = vld [vmem:[%s2711_s26 + $0x10] sm:$0xff] (!%p2012_p4)  ;;  %v675_v52 = vlaneseq (!%p2012_p4) }
 0x12a   : > { %632 = sbr.rel (%p2012_p4) target bundleno = 575 (0x23f), region = 56  ;;  %797 = vmatprep.mubr.bf16.mxu0 (!%p2012_p4), %v2556_v13  ;;  %837 = vmatprep.mubr.bf16.mxu1 (!%p2012_p4), %v2556_v13  ;;  %v2321_v14 = vld [vmem:[%s3413_s5 + $0x14] ss:$8 sps:$4 sm:$0xff] (!%p2012_p4)   ;;  %v2323_v15 = vld [vmem:[%s3413_s5 + $0x10] ss:$8 sps:$4 sm:$0xff] (!%p2012_p4)   ;;  %v633_v28 = vld [vmem:[%s2711_s26] sm:$0xff] (!%p2012_p4) }
 0x12b   : > { %765 = vmatprep.subr.bf16.mxu0 (!%p2012_p4), %v2318_v11  ;;  %2200 = vmatprep.subr.bf16.mxu1 (!%p2012_p4), %v2318_v11  ;;  %v2324_v16 = vld [vmem:[%s3413_s5 + $0x24] ss:$8 sps:$4 sm:$0xff] (!%p2012_p4)   ;;  %v2326_v17 = vld [vmem:[%s3413_s5 + $0x20] ss:$8 sps:$4 sm:$0xff] (!%p2012_p4)   ;;  %v2327_v18 = vld [vmem:[%s3413_s5 + $0x34] ss:$8 sps:$4 sm:$0xff] (!%p2012_p4)  }
 0x12c   : > { %766 = vmatpush1.bf16.msra.mxu0 (!%p2012_p4), %v2320_v12  ;;  %2208 = vmatpush1.bf16.msra.mxu1 (!%p2012_p4), %v2320_v12  ;;  %v2329_v19 = vld [vmem:[%s3413_s5 + $0x30] ss:$8 sps:$4 sm:$0xff] (!%p2012_p4)   ;;  %v2330_v20 = vld [vmem:[%s3413_s5 + $0x44] ss:$8 sps:$4 sm:$0xff] (!%p2012_p4)   ;;  %v2332_v21 = vld [vmem:[%s3413_s5 + $0x40] ss:$8 sps:$4 sm:$0xff] (!%p2012_p4)  }
 0x12d   : > { %767 = vmatprep.subr.bf16.mxu0 (!%p2012_p4), %v2321_v14  ;;  %2201 = vmatprep.subr.bf16.mxu1 (!%p2012_p4), %v2321_v14  ;;  %v2333_v22 = vld [vmem:[%s3413_s5 + $0x54] ss:$8 sps:$4 sm:$0xff] (!%p2012_p4)   ;;  %v2335_v23 = vld [vmem:[%s3413_s5 + $0x50] ss:$8 sps:$4 sm:$0xff] (!%p2012_p4)   ;;  %v2336_v24 = vld [vmem:[%s3413_s5 + $0x64] ss:$8 sps:$4 sm:$0xff] (!%p2012_p4)  }
 0x12e   : > { %v2338_v25 = vld [vmem:[%s3413_s5 + $0x60] ss:$8 sps:$4 sm:$0xff] (!%p2012_p4)   ;;  %v2339_v26 = vld [vmem:[%s3413_s5 + $0x74] ss:$8 sps:$4 sm:$0xff] (!%p2012_p4)   ;;  %v2341_v27 = vld [vmem:[%s3413_s5 + $0x70] ss:$8 sps:$4 sm:$0xff] (!%p2012_p4)  }
 0x12f   : > { %v634_v29 = vld [vmem:[%s2711_s26 + $0x8] sm:$0xff] (!%p2012_p4)  ;;  %v641_v30 = vld [vmem:[%s2711_s26 + $0x40] sm:$0xff] (!%p2012_p4)  ;;  %v636_v35 = vld [vmem:[%s2711_s26 + $0x18] sm:$0xff] (!%p2012_p4)  ;;  %v676_v53 = vshrl.u32 (!%p2012_p4), %v675_v52, 7  ;;  %s886_s30 = sshra.s32 (!%p2012_p4), %s2001_s22, 4 }
 0x130   : > { %768 = vmatpush1.bf16.msra.mxu0 (!%p2012_p4), %v2323_v15  ;;  %2209 = vmatpush1.bf16.msra.mxu1 (!%p2012_p4), %v2323_v15  ;;  %v642_v31 = vld [vmem:[%s2711_s26 + $0x48] sm:$0xff] (!%p2012_p4)  ;;  %v649_v32 = vpack.c.bf16 (!%p2012_p4), %v634_v29, %v633_v28  ;;  %v643_v36 = vld [vmem:[%s2711_s26 + $0x50] sm:$0xff] (!%p2012_p4)  ;;  %v644_v37 = vld [vmem:[%s2711_s26 + $0x58] sm:$0xff] (!%p2012_p4)  ;;  %v650_v38 = vpack.c.bf16 (!%p2012_p4), %v636_v35, %v635_v34 }
 0x131   : > { %769 = vmatprep.subr.bf16.mxu0 %v2324_v16  ;;  %2202 = vmatprep.subr.bf16.mxu1 %v2324_v16  ;;  %v653_v33 = vpack.c.bf16 %v642_v31, %v641_v30  ;;  %v654_v39 = vpack.c.bf16 %v644_v37, %v643_v36  ;;  %v637_v40 = vld [vmem:[%s2711_s26 + $0x20] sm:$0xff]  ;;  %v638_v41 = vld [vmem:[%s2711_s26 + $0x28] sm:$0xff]  ;;  %v639_v46 = vld [vmem:[%s2711_s26 + $0x30] sm:$0xff]  ;;  %v677_v54 = vsub.s32 0, %v676_v53  ;;  %v681_v56 = vsub.s32 1, %v676_v53 }
 0x132   : > { %v645_v42 = vld [vmem:[%s2711_s26 + $0x60] sm:$0xff]  ;;  %v646_v43 = vld [vmem:[%s2711_s26 + $0x68] sm:$0xff]  ;;  %v651_v44 = vpack.c.bf16 %v638_v41, %v637_v40  ;;  %v640_v47 = vld [vmem:[%s2711_s26 + $0x38] sm:$0xff] }
 0x133   : > { %v655_v45 = vpack.c.bf16 %v646_v43, %v645_v42  ;;  %v647_v48 = vld [vmem:[%s2711_s26 + $0x70] sm:$0xff]  ;;  %v648_v49 = vld [vmem:[%s2711_s26 + $0x78] sm:$0xff]  ;;  %v652_v50 = vpack.c.bf16 %v640_v47, %v639_v46  ;;  %v673_v55 = vld [vmem:[%s3414_s6] sm:$0x3]  ;;  %s2029_s26 = sshll.u32 %s886_s30, 3 }
 0x134   : > { %770 = vmatpush1.bf16.msra.mxu0 %v2326_v17  ;;  %2210 = vmatpush1.bf16.msra.mxu1 %v2326_v17  ;;  %v656_v51 = vpack.c.bf16 %v648_v49, %v647_v48  ;;  %v2869_v57 = vrot.slane %v673_v55, %v677_v54  ;;  %v2871_v60 = vrot.slane %v673_v55, %v681_v56  ;;  %s2881_s20 = scalar_lea.vmem [#allocation6], %s2029_s26  ;;  %s2885_s21 = scalar_lea.vmem [#allocation7], %s2029_s26 }
 0x135   : > { %771 = vmatprep.subr.bf16.mxu0 %v2327_v18  ;;  %2203 = vmatprep.subr.bf16.mxu1 %v2327_v18 }
 0x138   : > { %772 = vmatpush1.bf16.msra.mxu0 %v2329_v19  ;;  %2211 = vmatpush1.bf16.msra.mxu1 %v2329_v19 }
 0x139   : > { %773 = vmatprep.subr.bf16.mxu0 %v2330_v20  ;;  %2204 = vmatprep.subr.bf16.mxu1 %v2330_v20 }
 0x13c   : > { %774 = vmatpush1.bf16.msra.mxu0 %v2332_v21  ;;  %2212 = vmatpush1.bf16.msra.mxu1 %v2332_v21 }
 0x13d   : > { %775 = vmatprep.subr.bf16.mxu0 %v2333_v22  ;;  %2205 = vmatprep.subr.bf16.mxu1 %v2333_v22 }
 0x140   : > { %776 = vmatpush1.bf16.msra.mxu0 %v2335_v23  ;;  %2213 = vmatpush1.bf16.msra.mxu1 %v2335_v23 }
 0x141   : > { %777 = vmatprep.subr.bf16.mxu0 %v2336_v24  ;;  %2206 = vmatprep.subr.bf16.mxu1 %v2336_v24 }
 0x144   : > { %778 = vmatpush1.bf16.msra.mxu0 %v2338_v25  ;;  %2214 = vmatpush1.bf16.msra.mxu1 %v2338_v25 }
 0x145   : > { %779 = vmatprep.subr.bf16.mxu0 %v2339_v26  ;;  %2207 = vmatprep.subr.bf16.mxu1 %v2339_v26 }
 0x148   : > { %780 = vmatpush1.bf16.msra.mxu0 %v2341_v27  ;;  %2215 = vmatpush1.bf16.msra.mxu1 %v2341_v27 }
 0x14b   : > { %798 = vmatmul.mubr.bf16.vlgmr.msra.gmra.mrb[0].mxu0 %v649_v32  ;;  %838 = vmatmul.mubr.bf16.vlgmr.msra.gmra.mrb[0].mxu1 %v653_v33 }
 0x14c   : > { %807 = vmatprep.mubr.bf16.mxu0 %v2556_v13  ;;  %847 = vmatprep.mubr.bf16.mxu1 %v2556_v13 }
 0x153   : > { %808 = vmatmul.mubr.bf16.gmra.mrb[4].mxu0 %v650_v38  ;;  %848 = vmatmul.mubr.bf16.gmra.mrb[4].mxu1 %v654_v39 }
 0x154   : > { %817 = vmatprep.mubr.bf16.mxu0 %v2556_v13  ;;  %857 = vmatprep.mubr.bf16.mxu1 %v2556_v13 }
 0x15b   : > { %818 = vmatmul.mubr.bf16.gmra.mrb[8].mxu0 %v651_v44  ;;  %858 = vmatmul.mubr.bf16.gmra.mrb[8].mxu1 %v655_v45 }
 0x15c   : > { %827 = vmatprep.mubr.bf16.mxu0 %v2556_v13  ;;  %867 = vmatprep.mubr.bf16.mxu1 %v2556_v13 }
 0x163   : > { %828 = vmatmul.mubr.bf16.gmra.mrb[12].mxu0 %v652_v50  ;;  %868 = vmatmul.mubr.bf16.gmra.mrb[12].mxu1 %v656_v51 }
 0x21e   : > { %v799_v58 = vpop.f32.mrb[0].mxu0  ;;  %v839_v59 = vpop.f32.mrb[0].mxu1 }
 0x21f   : > { %v801_v61 = vpop.f32.mrb[1].mxu0  ;;  %v841_v62 = vpop.f32.mrb[1].mxu1  ;;  %v800_v1 = vadd.f32 %v799_v58, %v2869_v57  ;;  %v840_v2 = vadd.f32 %v839_v59, %v2869_v57 }
 0x220   : > { %v803_v63 = vpop.f32.mrb[2].mxu0  ;;  %v843_v0 = vpop.f32.mrb[2].mxu1  ;;  %v802_v7 = vadd.f32 %v801_v61, %v2871_v60  ;;  %v842_v8 = vadd.f32 %v841_v62, %v2871_v60 }
 0x221   : > { %v804_v3 = vadd.f32 %v803_v63, %v2869_v57  ;;  %v844_v4 = vadd.f32 %v843_v0, %v2869_v57  ;;  %v805_v5 = vpop.f32.mrb[3].mxu0  ;;  %v845_v6 = vpop.f32.mrb[3].mxu1 }
 0x222   : > { %v806_v9 = vadd.f32 %v805_v5, %v2871_v60  ;;  %v846_v10 = vadd.f32 %v845_v6, %v2871_v60 }
 0x223   : > { %v878_v11 = vpack.c.bf16 %v804_v3, %v800_v1  ;;  %v882_v12 = vpack.c.bf16 %v844_v4, %v840_v2 }
 0x224   : > { %v898_v13 = vpack.c.bf16 %v806_v9, %v802_v7  ;;  %v902_v14 = vpack.c.bf16 %v846_v10, %v842_v8 }
 0x225   : > { %890 = vst [vmem:[%s2881_s20] sm:$0xff] %v878_v11  ;;  %894 = vst [vmem:[%s2881_s20 + $0x20] sm:$0xff] %v882_v12 }
 0x226   : > { %908 = vst [vmem:[%s2885_s21] sm:$0xff] %v898_v13  ;;  %912 = vst [vmem:[%s2885_s21 + $0x20] sm:$0xff] %v902_v14  ;;  %v809_v15 = vpop.f32.mrb[4].mxu0  ;;  %v849_v16 = vpop.f32.mrb[4].mxu1 }
 0x227   : > { %v811_v17 = vpop.f32.mrb[5].mxu0  ;;  %v851_v18 = vpop.f32.mrb[5].mxu1  ;;  %v810_v21 = vadd.f32 %v809_v15, %v2869_v57  ;;  %v850_v22 = vadd.f32 %v849_v16, %v2869_v57 }
 0x228   : > { %v813_v19 = vpop.f32.mrb[6].mxu0  ;;  %v853_v20 = vpop.f32.mrb[6].mxu1  ;;  %v812_v27 = vadd.f32 %v811_v17, %v2871_v60  ;;  %v852_v28 = vadd.f32 %v851_v18, %v2871_v60 }
 0x229   : > { %v814_v23 = vadd.f32 %v813_v19, %v2869_v57  ;;  %v854_v24 = vadd.f32 %v853_v20, %v2869_v57  ;;  %v815_v25 = vpop.f32.mrb[7].mxu0  ;;  %v855_v26 = vpop.f32.mrb[7].mxu1 }
 0x22a   : > { %v816_v29 = vadd.f32 %v815_v25, %v2871_v60  ;;  %v856_v30 = vadd.f32 %v855_v26, %v2871_v60 }
 0x22b   : > { %v879_v31 = vpack.c.bf16 %v814_v23, %v810_v21  ;;  %v883_v32 = vpack.c.bf16 %v854_v24, %v850_v22 }
 0x22c   : > { %v899_v33 = vpack.c.bf16 %v816_v29, %v812_v27  ;;  %v903_v34 = vpack.c.bf16 %v856_v30, %v852_v28 }
 0x22d   : > { %891 = vst [vmem:[%s2881_s20 + $0x8] sm:$0xff] %v879_v31  ;;  %895 = vst [vmem:[%s2881_s20 + $0x28] sm:$0xff] %v883_v32 }
 0x22e   : > { %909 = vst [vmem:[%s2885_s21 + $0x8] sm:$0xff] %v899_v33  ;;  %913 = vst [vmem:[%s2885_s21 + $0x28] sm:$0xff] %v903_v34  ;;  %v819_v35 = vpop.f32.mrb[8].mxu0  ;;  %v859_v36 = vpop.f32.mrb[8].mxu1 }
 0x22f   : > { %v821_v37 = vpop.f32.mrb[9].mxu0  ;;  %v861_v38 = vpop.f32.mrb[9].mxu1  ;;  %v820_v41 = vadd.f32 %v819_v35, %v2869_v57  ;;  %v860_v42 = vadd.f32 %v859_v36, %v2869_v57 }
 0x230   : > { %v823_v39 = vpop.f32.mrb[10].mxu0  ;;  %v863_v40 = vpop.f32.mrb[10].mxu1  ;;  %v822_v47 = vadd.f32 %v821_v37, %v2871_v60  ;;  %v862_v48 = vadd.f32 %v861_v38, %v2871_v60 }
 0x231   : > { %v824_v43 = vadd.f32 %v823_v39, %v2869_v57  ;;  %v864_v44 = vadd.f32 %v863_v40, %v2869_v57  ;;  %v825_v45 = vpop.f32.mrb[11].mxu0  ;;  %v865_v46 = vpop.f32.mrb[11].mxu1 }
 0x232   : > { %v826_v49 = vadd.f32 %v825_v45, %v2871_v60  ;;  %v866_v50 = vadd.f32 %v865_v46, %v2871_v60 }
 0x233   : > { %v880_v51 = vpack.c.bf16 %v824_v43, %v820_v41  ;;  %v884_v52 = vpack.c.bf16 %v864_v44, %v860_v42 }
 0x234   : > { %v900_v53 = vpack.c.bf16 %v826_v49, %v822_v47  ;;  %v904_v54 = vpack.c.bf16 %v866_v50, %v862_v48 }
 0x235   : > { %892 = vst [vmem:[%s2881_s20 + $0x10] sm:$0xff] %v880_v51  ;;  %896 = vst [vmem:[%s2881_s20 + $0x30] sm:$0xff] %v884_v52 }
 0x236   : > { %910 = vst [vmem:[%s2885_s21 + $0x10] sm:$0xff] %v900_v53  ;;  %914 = vst [vmem:[%s2885_s21 + $0x30] sm:$0xff] %v904_v54  ;;  %v829_v55 = vpop.f32.mrb[12].mxu0  ;;  %v869_v56 = vpop.f32.mrb[12].mxu1 }
 0x237   : > { %v831_v58 = vpop.f32.mrb[13].mxu0  ;;  %v871_v59 = vpop.f32.mrb[13].mxu1  ;;  %v830_v63 = vadd.f32 %v829_v55, %v2869_v57  ;;  %v870_v0 = vadd.f32 %v869_v56, %v2869_v57 }
 0x238   : > { %v833_v61 = vpop.f32.mrb[14].mxu0  ;;  %v873_v62 = vpop.f32.mrb[14].mxu1  ;;  %v832_v5 = vadd.f32 %v831_v58, %v2871_v60  ;;  %v872_v6 = vadd.f32 %v871_v59, %v2871_v60 }
 0x239   : > { %v834_v1 = vadd.f32 %v833_v61, %v2869_v57  ;;  %v874_v2 = vadd.f32 %v873_v62, %v2869_v57  ;;  %v835_v3 = vpop.f32.mrb[15].mxu0  ;;  %v875_v4 = vpop.f32.mrb[15].mxu1 }
 0x23a   : > { %v836_v7 = vadd.f32 %v835_v3, %v2871_v60  ;;  %v876_v8 = vadd.f32 %v875_v4, %v2871_v60 }
 0x23b   : > { %v881_v9 = vpack.c.bf16 %v834_v1, %v830_v63  ;;  %v885_v10 = vpack.c.bf16 %v874_v2, %v870_v0 }
 0x23c   : > { %v901_v11 = vpack.c.bf16 %v836_v7, %v832_v5  ;;  %v905_v12 = vpack.c.bf16 %v876_v8, %v872_v6 }
 0x23d   : > { %893 = vst [vmem:[%s2881_s20 + $0x18] sm:$0xff] %v881_v9  ;;  %897 = vst [vmem:[%s2881_s20 + $0x38] sm:$0xff] %v885_v10 }
 0x23e   : > { %911 = vst [vmem:[%s2885_s21 + $0x18] sm:$0xff] %v901_v11  ;;  %915 = vst [vmem:[%s2885_s21 + $0x38] sm:$0xff] %v905_v12 }
 0x23f PF: > { %s2927_s14 = sshra.s32 %s2001_s22, 4  ;;  %v938_v57 = vld [vmem:[#allocation2] sm:$0xff]  ;;  %v939_v20 = vld [vmem:[#allocation2 + $0x8] sm:$0xff]  ;;  %v940_v21 = vld [vmem:[#allocation2 + $0x10] sm:$0xff]  ;;  %v2557_v36 = vmov 0   ;;  %vm1363_vm1 = vcmask 7168  }
 0x240   : > { %s2031_s15 = sshll.u32 %s2927_s14, 3  ;;  %2136 = vmatprep.mubr.bf16.mxu0 %v938_v57  ;;  %v941_v22 = vld [vmem:[#allocation2 + $0x18] sm:$0xff]  ;;  %v942_v23 = vld [vmem:[#allocation2 + $0x20] sm:$0xff]  ;;  %v943_v24 = vld [vmem:[#allocation2 + $0x28] sm:$0xff]  ;;  %2343 = vset.pattern.permute.xlu1 %v2557_v36  ;;  %p2033_p5 = scmp.ne.s32.totalorder %s2528_s29, 1 }
 0x241   : > { %s919_s28 = scalar_lea.vmem [#allocation6], %s2031_s15  ;;  %v944_v25 = vld [vmem:[#allocation2 + $0x30] sm:$0xff]  ;;  %v945_v26 = vld [vmem:[#allocation2 + $0x38] sm:$0xff]  ;;  %2342 = vset.pattern.permute.xlu0 %v2557_v36  ;;  %s2982_s22 = scalar_lea.vmem [#allocation7], %s2031_s15  ;;  %v2988_v47 = vld [vmem:[#allocation3] sm:$0xff] }
 0x242   : > { %v2986_v46 = vld [vmem:[#allocation3 + $0x10] sm:$0xff]  ;;  %v2996_v52 = vld [vmem:[#allocation3 + $0x18] sm:$0xff]  ;;  %v3001_v53 = vld [vmem:[#allocation3 + $0x8] sm:$0xff]  ;;  %s1793_s29 = sld [smem:[#allocation8]] (!%p2033_p5) }
 0x243   : > { %v3016_v61 = vld [vmem:[#allocation3 + $0x20] sm:$0xff]  ;;  %v3020_v62 = vld [vmem:[#allocation3 + $0x38] sm:$0xff]  ;;  %v3030_v4 = vld [vmem:[#allocation3 + $0x30] sm:$0xff] }
 0x244   : > { %v920_v60 = vld [vmem:[%s919_s28] sm:$0xff]  ;;  %v921_v13 = vld [vmem:[%s919_s28 + $0x8] sm:$0xff]  ;;  %v922_v14 = vld [vmem:[%s919_s28 + $0x10] sm:$0xff] }
 0x245   : > { %2120 = vmatprep.subr.bf16.mxu0 %v920_v60  ;;  %v923_v15 = vld [vmem:[%s919_s28 + $0x18] sm:$0xff]  ;;  %v924_v16 = vld [vmem:[%s919_s28 + $0x20] sm:$0xff]  ;;  %v925_v17 = vld [vmem:[%s919_s28 + $0x28] sm:$0xff] }
 0x246   : > { %2121 = vmatpush3.bf16.xpose.msra.mxu0 %v920_v60  ;;  %v926_v18 = vld [vmem:[%s919_s28 + $0x30] sm:$0xff]  ;;  %v927_v19 = vld [vmem:[%s919_s28 + $0x38] sm:$0xff]  ;;  %v930_v44 = vld [vmem:[%s2982_s22] sm:$0xff] }
 0x247   : > { %2122 = vmatprep.subr.bf16.mxu0 %v921_v13  ;;  %v931_v45 = vld [vmem:[%s2982_s22 + $0x8] sm:$0xff]  ;;  %2152 = vmatprep.subr.bf16.mxu1 %v930_v44  ;;  %v932_v55 = vld [vmem:[%s2982_s22 + $0x10] sm:$0xff]  ;;  %v933_v63 = vld [vmem:[%s2982_s22 + $0x18] sm:$0xff] }
 0x248   : > { %2153 = vmatpush3.bf16.msra.mxu1 %v930_v44  ;;  %v3034_v5 = vld [vmem:[#allocation3 + $0x28] sm:$0xff]  ;;  %v934_v6 = vld [vmem:[%s2982_s22 + $0x20] sm:$0xff]  ;;  %v3050_v12 = vld [vmem:[#allocation3 + $0x58] sm:$0xff] }
 0x249   : > { %2154 = vmatprep.subr.bf16.mxu1 %v931_v45  ;;  %v3045_v11 = vld [vmem:[#allocation3 + $0x40] sm:$0xff]  ;;  %v935_v57 = vld [vmem:[%s2982_s22 + $0x28] sm:$0xff] }
 0x24c   : > { %2155 = vmatpush3.bf16.msra.mxu1 %v931_v45 }
 0x24d   : > { %2156 = vmatprep.subr.bf16.mxu1 %v932_v55 }
 0x24e   : > { %2123 = vmatpush3.bf16.xpose.msra.mxu0 %v921_v13 }
 0x24f   : > { %2124 = vmatprep.subr.bf16.mxu0 %v922_v14 }
 0x250   : > { %2157 = vmatpush3.bf16.msra.mxu1 %v932_v55 }
 0x251   : > { %2158 = vmatprep.subr.bf16.mxu1 %v933_v63 }
 0x254   : > { %2159 = vmatpush3.bf16.msra.mxu1 %v933_v63 }
 0x255   : > { %2160 = vmatprep.subr.bf16.mxu1 %v934_v6 }
 0x256   : > { %2125 = vmatpush3.bf16.xpose.msra.mxu0 %v922_v14 }
 0x257   : > { %2126 = vmatprep.subr.bf16.mxu0 %v923_v15 }
 0x258   : > { %2161 = vmatpush3.bf16.msra.mxu1 %v934_v6 }
 0x259   : > { %2162 = vmatprep.subr.bf16.mxu1 %v935_v57 }
 0x25c   : > { %2163 = vmatpush3.bf16.msra.mxu1 %v935_v57 }
 0x25e   : > { %2127 = vmatpush3.bf16.xpose.msra.mxu0 %v923_v15 }
 0x25f   : > { %2128 = vmatprep.subr.bf16.mxu0 %v924_v16 }
 0x266   : > { %2129 = vmatpush3.bf16.xpose.msra.mxu0 %v924_v16  ;;  %v3061_v16 = vld [vmem:[#allocation3 + $0x50] sm:$0xff] }
 0x267   : > { %2130 = vmatprep.subr.bf16.mxu0 %v925_v17 }
 0x26e   : > { %2131 = vmatpush3.bf16.xpose.msra.mxu0 %v925_v17  ;;  %v3066_v17 = vld [vmem:[#allocation3 + $0x48] sm:$0xff] }
 0x26f   : > { %2132 = vmatprep.subr.bf16.mxu0 %v926_v18 }
 0x276   : > { %2133 = vmatpush3.bf16.xpose.msra.mxu0 %v926_v18  ;;  %v936_v18 = vld [vmem:[%s2982_s22 + $0x30] sm:$0xff] }
 0x277   : > { %2134 = vmatprep.subr.bf16.mxu0 %v927_v19  ;;  %2164 = vmatprep.subr.bf16.mxu1 %v936_v18 }
 0x278   : > { %2165 = vmatpush3.bf16.msra.mxu1 %v936_v18 }
 0x27e   : > { %2135 = vmatpush3.bf16.xpose.msra.mxu0 %v927_v19 }
 0x285   : > { %2137 = vmatmul.mubr.bf16.vlgmr.msra.gmra.mrb[0].mxu0 %v939_v20 }
 0x286   : > { %2140 = vmatprep.mubr.bf16.mxu0 %v940_v21 }
 0x28d   : > { %2141 = vmatmul.mubr.bf16.gmra.mrb[4].mxu0 %v941_v22 }
 0x28e   : > { %2144 = vmatprep.mubr.bf16.mxu0 %v942_v23 }
 0x295   : > { %2145 = vmatmul.mubr.bf16.gmra.mrb[8].mxu0 %v943_v24  ;;  %v3079_v24 = vld [vmem:[#allocation3 + $0x60] sm:$0xff] }
 0x296   : > { %2148 = vmatprep.mubr.bf16.mxu0 %v944_v25  ;;  %v3084_v25 = vld [vmem:[#allocation3 + $0x78] sm:$0xff] }
 0x29d   : > { %2149 = vmatmul.mubr.bf16.gmra.mrb[12].mxu0 %v945_v26  ;;  %v937_v26 = vld [vmem:[%s2982_s22 + $0x38] sm:$0xff] }
 0x29e   : > { %2166 = vmatprep.subr.bf16.mxu1 %v937_v26 }
 0x29f   : > { %2167 = vmatpush3.bf16.msra.mxu1 %v937_v26 }
 0x358   : > { %v2932_v27 = vpop.f32.mrb[0].mxu0 }
 0x359   : > { %1063 = vmax.xlane.f32.xlu1 %v2932_v27  ;;  %v2935_v28 = vpop.f32.mrb[1].mxu0 }
 0x35a   : > { %1059 = vmax.xlane.f32.xlu0 %v2935_v28  ;;  %v2938_v29 = vpop.f32.mrb[2].mxu0 }
 0x35b   : > { %v2940_v30 = vpop.f32.mrb[3].mxu0 }
 0x35d   : > { %1065 = vmax.xlane.f32.xlu1 %v2938_v29 }
 0x35e   : > { %1061 = vmax.xlane.f32.xlu0 %v2940_v30 }
 0x360   : > { %v2944_v31 = vpop.f32.mrb[4].mxu0 }
 0x361   : > { %v2946_v32 = vpop.f32.mrb[5].mxu0 }
 0x362   : > { %1067 = vmax.xlane.f32.xlu0 %v2946_v32  ;;  %v2949_v33 = vpop.f32.mrb[6].mxu0 }
 0x363   : > { %1073 = vmax.xlane.f32.xlu1 %v2949_v33  ;;  %v2952_v34 = vpop.f32.mrb[7].mxu0 }
 0x366   : > { %1071 = vmax.xlane.f32.xlu0 %v2944_v31 }
 0x367   : > { %1069 = vmax.xlane.f32.xlu1 %v2952_v34 }
 0x368   : > { %v2956_v35 = vpop.f32.mrb[8].mxu0 }
 0x369   : > { %v2958_v37 = vpop.f32.mrb[9].mxu0 }
 0x36a   : > { %v2960_v38 = vpop.f32.mrb[10].mxu0  ;;  %1075 = vmax.xlane.f32.xlu0 %v2958_v37 }
 0x36b   : > { %1081 = vmax.xlane.f32.xlu1 %v2960_v38  ;;  %v2964_v39 = vpop.f32.mrb[11].mxu0 }
 0x36e   : > { %1079 = vmax.xlane.f32.xlu0 %v2956_v35 }
 0x36f   : > { %1077 = vmax.xlane.f32.xlu1 %v2964_v39 }
 0x370   : > { %v2968_v40 = vpop.f32.mrb[12].mxu0 }
 0x371   : > { %v2970_v41 = vpop.f32.mrb[13].mxu0 }
 0x372   : > { %v2972_v42 = vpop.f32.mrb[14].mxu0  ;;  %1083 = vmax.xlane.f32.xlu0 %v2970_v41 }
 0x373   : > { %1089 = vmax.xlane.f32.xlu1 %v2972_v42  ;;  %v2976_v43 = vpop.f32.mrb[15].mxu0 }
 0x376   : > { %1087 = vmax.xlane.f32.xlu0 %v2968_v40 }
 0x377   : > { %1085 = vmax.xlane.f32.xlu1 %v2976_v43 }
 0x3e6   : > { %v1064_v48 = vpop.xlane.xlu1 %1063 }
 0x3e7   : > { %v2991_v49 = vmax.f32 %v2986_v46, %v1064_v48  ;;  %v1060_v50 = vpop.xlane.xlu0 %1059 }
 0x3e8   : > { %v2994_v51 = vmax.f32 %v2988_v47, %v1060_v50 }
 0x3e9   : > { %1631 = vst.msk [vmem:[#allocation3 + $0x10] sm:$0xff] %vm1363_vm1, %v2991_v49  ;;  %1167 = vperm.xlu1 %2343, %v2991_v49  }
 0x3ea   : > { %1629 = vst.msk [vmem:[#allocation3] sm:$0xff] %vm1363_vm1, %v2994_v51  ;;  %v1066_v54 = vpop.xlane.xlu1 %1065  ;;  %1157 = vperm.xlu0 %2342, %v2994_v51   ;;  %v1107_v20 = vsub.f32 %v2988_v47, %v2994_v51  ;;  %v3098_v51 = vld [vmem:[#allocation3 + $0x70] sm:$0xff] }
 0x3eb   : > { %v3008_v56 = vmax.f32 %v2996_v52, %v1066_v54  ;;  %v1062_v58 = vpop.xlane.xlu0 %1061  ;;  %v1056_v54 = vld [vmem:[#allocation3 + $0x68] sm:$0xff] }
 0x3ec   : > { %v3011_v59 = vmax.f32 %v3001_v53, %v1062_v58  ;;  %v1123_v44 = vmul.f32 1.442695, %v1107_v20 }
 0x3ed   : > { %1632 = vst.msk [vmem:[#allocation3 + $0x18] sm:$0xff] %vm1363_vm1, %v3008_v56  ;;  %1172 = vperm.xlu1 %2343, %v3008_v56   ;;  %v1110_v45 = vsub.f32 %v2996_v52, %v3008_v56 }
 0x3ee   : > { %1630 = vst.msk [vmem:[#allocation3 + $0x8] sm:$0xff] %vm1363_vm1, %v3011_v59  ;;  %v1108_v55 = vsub.f32 %v3001_v53, %v3011_v59  ;;  %2344 = vpow2.f32 %v1123_v44 }
 0x3ef   : > { %v1068_v0 = vpop.xlane.xlu0 %1067  ;;  %v1129_v58 = vmul.f32 1.442695, %v1110_v45 }
 0x3f0   : > { %v3024_v1 = vmax.f32 %v3016_v61, %v1068_v0  ;;  %v1074_v2 = vpop.xlane.xlu1 %1073 }
 0x3f1   : > { %v3027_v3 = vmax.f32 %v3020_v62, %v1074_v2  ;;  %1162 = vperm.xlu1 %2343, %v3011_v59   ;;  %v1109_v59 = vsub.f32 %v2986_v46, %v2991_v49  ;;  %2346 = vpow2.f32 %v1129_v58 }
 0x3f2   : > { %1633 = vst.msk [vmem:[#allocation3 + $0x20] sm:$0xff] %vm1363_vm1, %v3024_v1  ;;  %v1111_v57 = vsub.f32 %v3016_v61, %v3024_v1 }
 0x3f3   : > { %1636 = vst.msk [vmem:[#allocation3 + $0x38] sm:$0xff] %vm1363_vm1, %v3027_v3  ;;  %v1072_v7 = vpop.xlane.xlu0 %1071 }
 0x3f4   : > { %v3040_v8 = vmax.f32 %v3030_v4, %v1072_v7  ;;  %v1070_v9 = vpop.xlane.xlu1 %1069  ;;  %v1125_v7 = vmul.f32 1.442695, %v1108_v55 }
 0x3f5   : > { %v3043_v10 = vmax.f32 %v3034_v5, %v1070_v9 }
 0x3f6   : > { %1635 = vst.msk [vmem:[#allocation3 + $0x30] sm:$0xff] %vm1363_vm1, %v3040_v8  ;;  %1187 = vperm.xlu1 %2343, %v3040_v8   ;;  %2348 = vpow2.f32 %v1125_v7 }
 0x3f7   : > { %1634 = vst.msk [vmem:[#allocation3 + $0x28] sm:$0xff] %vm1363_vm1, %v3043_v10  ;;  %v1076_v60 = vpop.xlane.xlu0 %1075  ;;  %v1112_v63 = vsub.f32 %v3034_v5, %v3043_v10  ;;  %v1114_v5 = vsub.f32 %v3020_v62, %v3027_v3  ;;  %v1131_v62 = vmul.f32 1.442695, %v1111_v57 }
 0x3f8   : > { %v1082_v13 = vpop.xlane.xlu1 %1081  ;;  %v3056_v14 = vmax.f32 %v3045_v11, %v1076_v60  ;;  %v3131_v49 = vpop.eup %2344 }
 0x3f9   : > { %v3059_v15 = vmax.f32 %v3050_v12, %v1082_v13  ;;  %v1133_v9 = vmul.f32 1.442695, %v1112_v63  ;;  %v1137_v60 = vmul.f32 1.442695, %v1114_v5 }
 0x3fa   : > { %1637 = vst.msk [vmem:[#allocation3 + $0x40] sm:$0xff] %vm1363_vm1, %v3056_v14  ;;  %1177 = vperm.xlu1 %2343, %v3024_v1  }
 0x3fb   : > { %1640 = vst.msk [vmem:[#allocation3 + $0x58] sm:$0xff] %vm1363_vm1, %v3059_v15  ;;  %v1080_v19 = vpop.xlane.xlu0 %1079  ;;  %2350 = vpow2.f32 %v1133_v9  ;;  %v1118_v46 = vsub.f32 %v3050_v12, %v3059_v15  ;;  %v3139_v13 = vpop.eup %2346 }
 0x3fc   : > { %v1078_v21 = vpop.xlane.xlu1 %1077  ;;  %v3074_v22 = vmax.f32 %v3061_v16, %v1080_v19 }
 0x3fd   : > { %v3077_v23 = vmax.f32 %v3066_v17, %v1078_v21  ;;  %v1145_v61 = vmul.f32 1.442695, %v1118_v46 }
 0x3fe   : > { %1639 = vst.msk [vmem:[#allocation3 + $0x50] sm:$0xff] %vm1363_vm1, %v3074_v22  ;;  %1182 = vperm.xlu1 %2343, %v3043_v10   ;;  %v1127_v10 = vmul.f32 1.442695, %v1109_v59 }
 0x3ff   : > { %1638 = vst.msk [vmem:[#allocation3 + $0x48] sm:$0xff] %vm1363_vm1, %v3077_v23  ;;  %1202 = vperm.xlu0 %2342, %v3077_v23   ;;  %v1084_v36 = vpop.xlane.xlu0 %1083  ;;  %v1116_v1 = vsub.f32 %v3066_v17, %v3077_v23  ;;  %v1115_v17 = vsub.f32 %v3045_v11, %v3056_v14 }
 0x400   : > { %v1090_v47 = vpop.xlane.xlu1 %1089  ;;  %v3093_v48 = vmax.f32 %v3079_v24, %v1084_v36  ;;  %2352 = vpow2.f32 %v1127_v10  ;;  %v3145_v18 = vpop.eup %2348 }
 0x401   : > { %v3096_v50 = vmax.f32 %v3084_v25, %v1090_v47  ;;  %2354 = vpow2.f32 %v1137_v60  ;;  %v1139_v23 = vmul.f32 1.442695, %v1115_v17 }
 0x402   : > { %1641 = vst.msk [vmem:[#allocation3 + $0x60] sm:$0xff] %vm1363_vm1, %v3093_v48  ;;  %1192 = vperm.xlu1 %2343, %v3027_v3   ;;  %v1113_v3 = vsub.f32 %v3030_v4, %v3040_v8  ;;  %2356 = vpow2.f32 %v1131_v62  ;;  %v1141_v4 = vmul.f32 1.442695, %v1116_v1  ;;  %v1119_v26 = vsub.f32 %v3079_v24, %v3093_v48 }
 0x403   : > { %v1122_v52 = vsub.f32 %v3084_v25, %v3096_v50  ;;  %1644 = vst.msk [vmem:[#allocation3 + $0x78] sm:$0xff] %vm1363_vm1, %v3096_v50  ;;  %1212 = vperm.xlu0 %2342, %v3059_v15   ;;  %v1088_v56 = vpop.xlane.xlu0 %1087  ;;  %v1117_v15 = vsub.f32 %v3061_v16, %v3074_v22  ;;  %2358 = vpow2.f32 %v1145_v61 }
 0x404   : > { %v1086_v0 = vpop.xlane.xlu1 %1085  ;;  %v3113_v2 = vmax.f32 %v3098_v51, %v1088_v56  ;;  %v1135_v12 = vmul.f32 1.442695, %v1113_v3  ;;  %v1147_v36 = vmul.f32 1.442695, %v1119_v26 }
 0x405   : > { %v1104_v6 = vmax.f32 %v1056_v54, %v1086_v0  ;;  %v3147_v19 = vpop.eup %2350  ;;  %v1143_v20 = vmul.f32 1.442695, %v1117_v15 }
 0x406   : > { %v1121_v53 = vsub.f32 %v3098_v51, %v3113_v2  ;;  %1643 = vst.msk [vmem:[#allocation3 + $0x70] sm:$0xff] %vm1363_vm1, %v3113_v2  ;;  %1197 = vperm.xlu1 %2343, %v3056_v14   ;;  %2360 = vpow2.f32 %v1135_v12 }
 0x407   : > { %1642 = vst.msk [vmem:[#allocation3 + $0x68] sm:$0xff] %vm1363_vm1, %v1104_v6  ;;  %1222 = vperm.xlu0 %2342, %v1104_v6   ;;  %v1120_v8 = vsub.f32 %v1056_v54, %v1104_v6  ;;  %2362 = vpow2.f32 %v1141_v4 }
 0x408   : > { %2364 = vpow2.f32 %v1143_v20 }
 0x409   : > { %v1149_v16 = vmul.f32 1.442695, %v1120_v8 }
 0x40a   : > { %1207 = vperm.xlu1 %2343, %v3074_v22   ;;  %v3153_v21 = vpop.eup %2352 }
 0x40b   : > { %1232 = vperm.xlu0 %2342, %v3096_v50   ;;  %v3155_v22 = vpop.eup %2354  ;;  %2366 = vpow2.f32 %v1149_v16 }
 0x40c   : > { %v3161_v11 = vpop.eup %2356  ;;  %2368 = vpow2.f32 %v1139_v23 }
 0x40d   : > { %v3163_v14 = vpop.eup %2358  ;;  %2370 = vpow2.f32 %v1147_v36 }
 0x40e   : > { %1217 = vperm.xlu1 %2343, %v3093_v48  }
 0x40f   : > { %1398 = vperm.xlu0 %2342, %v3131_v49  }
 0x410   : > { %v3167_v44 = vpop.eup %2360 }
 0x411   : > { %v3169_v45 = vpop.eup %2362 }
 0x412   : > { %1227 = vperm.xlu1 %2343, %v3113_v2   ;;  %v3173_v24 = vpop.eup %2364 }
 0x413   : > { %1413 = vperm.xlu0 %2342, %v3139_v13  }
 0x415   : > { %v3175_v47 = vpop.eup %2366 }
 0x416   : > { %1403 = vperm.xlu1 %2343, %v3145_v18   ;;  %v3179_v48 = vpop.eup %2368 }
 0x417   : > { %1423 = vperm.xlu0 %2342, %v3147_v19   ;;  %v3182_v54 = vpop.eup %2370 }
 0x41a   : > { %1408 = vperm.xlu1 %2343, %v3153_v21  }
 0x41b   : > { %1433 = vperm.xlu0 %2342, %v3155_v22  }
 0x41e   : > { %1418 = vperm.xlu1 %2343, %v3161_v11  }
 0x41f   : > { %1453 = vperm.xlu0 %2342, %v3163_v14  }
 0x422   : > { %1428 = vperm.xlu1 %2343, %v3167_v44  }
 0x423   : > { %1443 = vperm.xlu0 %2342, %v3169_v45  }
 0x426   : > { %1448 = vperm.xlu1 %2343, %v3173_v24  }
 0x427   : > { %1463 = vperm.xlu0 %2342, %v3175_v47  }
 0x42a   : > { %1438 = vperm.xlu1 %2343, %v3179_v48  }
 0x42e   : > { %1458 = vperm.xlu1 %2343, %v3182_v54  }
 0x468   : > { %v1168_v55 = vpop.permute.xlu1 %1167 }
 0x469   : > { %v1237_v56 = vsub.f32 %v2932_v27, %v1168_v55  ;;  %v1158_v58 = vpop.permute.xlu0 %1157 }
 0x46a   : > { %v1235_v63 = vsub.f32 %v2935_v28, %v1158_v58 }
 0x46b   : > { %v1255_v0 = vmul.f32 1.442695, %v1237_v56 }
 0x46c   : > { %v1251_v6 = vmul.f32 1.442695, %v1235_v63  ;;  %v1173_v59 = vpop.permute.xlu1 %1172 }
 0x46d   : > { %2372 = vpow2.f32 %v1255_v0  ;;  %v1238_v7 = vsub.f32 %v2938_v29, %v1173_v59 }
 0x46e   : > { %2374 = vpow2.f32 %v1251_v6 }
 0x46f   : > { %v1257_v5 = vmul.f32 1.442695, %v1238_v7 }
 0x470   : > { %v1163_v9 = vpop.permute.xlu1 %1162 }
 0x471   : > { %2376 = vpow2.f32 %v1257_v5  ;;  %v1236_v10 = vsub.f32 %v2940_v30, %v1163_v9 }
 0x473   : > { %v1253_v57 = vmul.f32 1.442695, %v1236_v10 }
 0x475   : > { %2378 = vpow2.f32 %v1253_v57  ;;  %v1188_v60 = vpop.permute.xlu1 %1187 }
 0x476   : > { %v1241_v27 = vsub.f32 %v2944_v31, %v1188_v60 }
 0x477   : > { %v2373_v46 = vpop.eup %2372 }
 0x478   : > { %v2375_v62 = vpop.eup %2374  ;;  %v1263_v28 = vmul.f32 1.442695, %v1241_v27  ;;  %1319 = vadd.xlane.f32.xlu0 %v2373_v46 }
 0x479   : > { %1315 = vadd.xlane.f32.xlu1 %v2375_v62  ;;  %v1178_v3 = vpop.permute.xlu1 %1177 }
 0x47a   : > { %2380 = vpow2.f32 %v1263_v28  ;;  %v1239_v29 = vsub.f32 %v2946_v32, %v1178_v3 }
 0x47b   : > { %v2377_v61 = vpop.eup %2376 }
 0x47c   : > { %v1259_v1 = vmul.f32 1.442695, %v1239_v29  ;;  %v1493_v12 = vpack.c.bf16 %v2377_v61, %v2373_v46 }
 0x47d   : > { %1321 = vadd.xlane.f32.xlu1 %v2377_v61  ;;  %v1183_v15 = vpop.permute.xlu1 %1182 }
 0x47e   : > { %2382 = vpow2.f32 %v1259_v1  ;;  %v1240_v30 = vsub.f32 %v2952_v34, %v1183_v15  ;;  %v1203_v4 = vpop.permute.xlu0 %1202 }
 0x47f   : > { %v2379_v8 = vpop.eup %2378  ;;  %v1244_v20 = vsub.f32 %v2964_v39, %v1203_v4 }
 0x480   : > { %v1261_v31 = vmul.f32 1.442695, %v1240_v30  ;;  %1317 = vadd.xlane.f32.xlu0 %v2379_v8  ;;  %v1492_v17 = vpack.c.bf16 %v2379_v8, %v2375_v62 }
 0x481   : > { %v1193_v16 = vpop.permute.xlu1 %1192  ;;  %v1269_v55 = vmul.f32 1.442695, %v1244_v20  ;;  %v1151_v20 = vmul.f32 1.442695, %v1121_v53 }
 0x482   : > { %2384 = vpow2.f32 %v1261_v31  ;;  %v1242_v23 = vsub.f32 %v2949_v33, %v1193_v16  ;;  %v1213_v32 = vpop.permute.xlu0 %1212  ;;  %2168 = vmatprep.mubr.bf16.mxu1 %v1492_v17  ;;  %v1153_v16 = vmul.f32 1.442695, %v1122_v52 }
 0x483   : > { %2169 = vmatmul.mubr.bf16.vlgmr.msra.gmra.mrb[0].mxu1 %v1493_v12  ;;  %v1246_v56 = vsub.f32 %v2960_v38, %v1213_v32 }
 0x484   : > { %v2381_v26 = vpop.eup %2380  ;;  %v1265_v36 = vmul.f32 1.442695, %v1242_v23 }
 0x485   : > { %1327 = vadd.xlane.f32.xlu0 %v2381_v26  ;;  %v1198_v34 = vpop.permute.xlu1 %1197  ;;  %v1273_v6 = vmul.f32 1.442695, %v1246_v56 }
 0x486   : > { %2386 = vpow2.f32 %v1265_v36  ;;  %v1243_v58 = vsub.f32 %v2958_v37, %v1198_v34  ;;  %v1223_v63 = vpop.permute.xlu0 %1222 }
 0x487   : > { %2388 = vpow2.f32 %v1269_v55  ;;  %v1248_v33 = vsub.f32 %v2976_v43, %v1223_v63 }
 0x488   : > { %v2383_v0 = vpop.eup %2382  ;;  %v1267_v39 = vmul.f32 1.442695, %v1243_v58 }
 0x489   : > { %1323 = vadd.xlane.f32.xlu0 %v2383_v0  ;;  %v1208_v59 = vpop.permute.xlu1 %1207  ;;  %v1277_v10 = vmul.f32 1.442695, %v1248_v33 }
 0x48a   : > { %2390 = vpow2.f32 %v1267_v39  ;;  %v1245_v7 = vsub.f32 %v2956_v35, %v1208_v59  ;;  %v1233_v5 = vpop.permute.xlu0 %1232 }
 0x48b   : > { %2392 = vpow2.f32 %v1273_v6  ;;  %v1250_v57 = vsub.f32 %v2972_v42, %v1233_v5  ;;  %v1283_v6 = vld [vmem:[#allocation4] sm:$0xff] }
 0x48c   : > { %v2385_v9 = vpop.eup %2384  ;;  %v1271_v38 = vmul.f32 1.442695, %v1245_v7  ;;  %v1299_v7 = vmul.f32 %v3131_v49, %v1283_v6  ;;  %v1289_v49 = vld [vmem:[#allocation4 + $0x30] sm:$0xff] }
 0x48d   : > { %v1218_v37 = vpop.permute.xlu1 %1217  ;;  %v1494_v60 = vpack.c.bf16 %v2385_v9, %v2383_v0  ;;  %v1281_v62 = vmul.f32 1.442695, %v1250_v57  ;;  %v1285_v0 = vld [vmem:[#allocation4 + $0x10] sm:$0xff] }
 0x48e   : > { %2394 = vpow2.f32 %v1271_v38  ;;  %v1247_v27 = vsub.f32 %v2970_v41, %v1218_v37  ;;  %v1301_v33 = vmul.f32 %v3153_v21, %v1285_v0  ;;  %v1286_v38 = vld [vmem:[#allocation4 + $0x18] sm:$0xff]  ;;  %v1284_v37 = vld [vmem:[#allocation4 + $0x8] sm:$0xff] }
 0x48f   : > { %2172 = vmatprep.mubr.bf16.mxu1 %v1494_v60  ;;  %2396 = vpow2.f32 %v1277_v10  ;;  %v1302_v57 = vmul.f32 %v3139_v13, %v1286_v38 }
 0x490   : > { %v2387_v46 = vpop.eup %2386  ;;  %v1275_v43 = vmul.f32 1.442695, %v1247_v27 }
 0x491   : > { %1329 = vadd.xlane.f32.xlu1 %v2387_v46  ;;  %v1228_v28 = vpop.permute.xlu1 %1227  ;;  %v1495_v35 = vpack.c.bf16 %v2387_v46, %v2381_v26  ;;  %v2389_v29 = vpop.eup %2388  ;;  %v1300_v46 = vmul.f32 %v3145_v18, %v1284_v37  ;;  %v1290_v18 = vld [vmem:[#allocation4 + $0x38] sm:$0xff]  ;;  %v1295_v37 = vld [vmem:[#allocation4 + $0x60] sm:$0xff] }
 0x492   : > { %2398 = vpow2.f32 %v1275_v43  ;;  %v1249_v3 = vsub.f32 %v2968_v40, %v1228_v28  ;;  %v3213_v26 = vpop.permute.xlu0 %1398 }
 0x493   : > { %2173 = vmatmul.mubr.bf16.gmra.mrb[4].mxu1 %v1495_v35  ;;  %2400 = vpow2.f32 %v1281_v62  ;;  %v1305_v62 = vmul.f32 %v3167_v44, %v1289_v49  ;;  %v1287_v35 = vld [vmem:[#allocation4 + $0x20] sm:$0xff] }
 0x494   : > { %v2391_v61 = vpop.eup %2390  ;;  %v1279_v42 = vmul.f32 1.442695, %v1249_v3  ;;  %v1303_v13 = vmul.f32 %v3161_v11, %v1287_v35  ;;  %v1381_v35 = vld [vmem:[#allocation5 + $0x8] sm:$0xff] }
 0x495   : > { %1325 = vadd.xlane.f32.xlu1 %v2385_v9  ;;  %v1496_v1 = vpack.c.bf16 %v2389_v29, %v2391_v61  ;;  %v2393_v41 = vpop.eup %2392  ;;  %v3215_v36 = vpop.permute.xlu1 %1403 }
 0x496   : > { %2402 = vpow2.f32 %v1279_v42  ;;  %v3217_v51 = vpop.permute.xlu0 %1413  ;;  %v1306_v42 = vmul.f32 %v3155_v22, %v1290_v18  ;;  %v1291_v22 = vld [vmem:[#allocation4 + $0x40] sm:$0xff]  ;;  %v1477_v18 = vmul.f32 %v3215_v36, %v1381_v35 }
 0x497   : > { %2176 = vmatprep.mubr.bf16.mxu1 %v1496_v1  ;;  %2404 = vpow2.f32 %v1151_v20  ;;  %v1292_v20 = vld [vmem:[#allocation4 + $0x48] sm:$0xff] }
 0x498   : > { %v2395_v12 = vpop.eup %2394  ;;  %2406 = vpow2.f32 %v1153_v16  ;;  %v1308_v6 = vmul.f32 %v3169_v45, %v1292_v20 }
 0x499   : > { %1337 = vadd.xlane.f32.xlu1 %v2393_v41  ;;  %1335 = vadd.xlane.f32.xlu0 %v2395_v12  ;;  %v1497_v15 = vpack.c.bf16 %v2393_v41, %v2395_v12  ;;  %v2397_v30 = vpop.eup %2396  ;;  %v3219_v2 = vpop.permute.xlu1 %1408  ;;  %v1288_v41 = vld [vmem:[#allocation4 + $0x28] sm:$0xff] }
 0x49a   : > { %v3221_v53 = vpop.permute.xlu0 %1423  ;;  %v1304_v44 = vmul.f32 %v3147_v19, %v1288_v41  ;;  %v1307_v19 = vmul.f32 %v3179_v48, %v1291_v22  ;;  %v1296_v48 = vld [vmem:[#allocation4 + $0x68] sm:$0xff] }
 0x49b   : > { %2177 = vmatmul.mubr.bf16.gmra.mrb[8].mxu1 %v1497_v15 }
 0x49c   : > { %v2399_v4 = vpop.eup %2398 }
 0x49d   : > { %1333 = vadd.xlane.f32.xlu1 %v2389_v29  ;;  %1331 = vadd.xlane.f32.xlu0 %v2391_v61  ;;  %v1498_v40 = vpack.c.bf16 %v2397_v30, %v2399_v4  ;;  %v2401_v8 = vpop.eup %2400  ;;  %v3223_v25 = vpop.permute.xlu1 %1418 }
 0x49e   : > { %v3225_v50 = vpop.permute.xlu0 %1433 }
 0x49f   : > { %2180 = vmatprep.mubr.bf16.mxu1 %v1498_v40 }
 0x4a0   : > { %v2403_v31 = vpop.eup %2402 }
 0x4a1   : > { %1345 = vadd.xlane.f32.xlu1 %v2401_v8  ;;  %1343 = vadd.xlane.f32.xlu0 %v2403_v31  ;;  %v1499_v17 = vpack.c.bf16 %v2401_v8, %v2403_v31  ;;  %v3207_v23 = vpop.eup %2404  ;;  %v3227_v52 = vpop.permute.xlu1 %1428 }
 0x4a2   : > { %v3210_v32 = vpop.eup %2406  ;;  %v3229_v55 = vpop.permute.xlu0 %1453 }
 0x4a3   : > { %2181 = vmatmul.mubr.bf16.gmra.mrb[12].mxu1 %v1499_v17 }
 0x4a5   : > { %1341 = vadd.xlane.f32.xlu1 %v2397_v30  ;;  %1339 = vadd.xlane.f32.xlu0 %v2399_v4  ;;  %v3231_v56 = vpop.permute.xlu1 %1448  ;;  %v1293_v30 = vld [vmem:[#allocation4 + $0x50] sm:$0xff]  ;;  %v1294_v4 = vld [vmem:[#allocation4 + $0x58] sm:$0xff] }
 0x4a6   : > { %v3233_v34 = vpop.permute.xlu0 %1443  ;;  %v1309_v11 = vmul.f32 %v3173_v24, %v1293_v30  ;;  %v1310_v8 = vmul.f32 %v3163_v14, %v1294_v4  ;;  %v1298_v24 = vld [vmem:[#allocation4 + $0x78] sm:$0xff] }
 0x4a7   : > { %v1314_v38 = vmul.f32 %v3210_v32, %v1298_v24  ;;  %v1387_v30 = vld [vmem:[#allocation5 + $0x38] sm:$0xff] }
 0x4a8   : > { %v1483_v36 = vmul.f32 %v3225_v50, %v1387_v30 }
 0x4a9   : > { %v3235_v58 = vpop.permute.xlu1 %1438 }
 0x4aa   : > { %v3237_v63 = vpop.permute.xlu0 %1463 }
 0x4ad   : > { %v3239_v39 = vpop.permute.xlu1 %1458 }
 0x4b6   : > { %1468 = vperm.xlu1 %2343, %v3207_v23  }
 0x4bb   : > { %1473 = vperm.xlu0 %2342, %v3210_v32   ;;  %v1382_v32 = vld [vmem:[#allocation5 + $0x10] sm:$0xff] }
 0x505   : > { %v1320_v59 = vpop.xlane.xlu0 %1319 }
 0x506   : > { %v1349_v5 = vadd.f32 %v1320_v59, %v1301_v33  ;;  %v1316_v9 = vpop.xlane.xlu1 %1315 }
 0x507   : > { %v1347_v10 = vadd.f32 %v1316_v9, %v1299_v7  ;;  %v1297_v7 = vld [vmem:[#allocation4 + $0x70] sm:$0xff] }
 0x508   : > { %1366 = vst.msk [vmem:[#allocation4 + $0x10] sm:$0xff] %vm1363_vm1, %v1349_v5  ;;  %v1313_v9 = vmul.f32 %v3207_v23, %v1297_v7 }
 0x509   : > { %1364 = vst.msk [vmem:[#allocation4] sm:$0xff] %vm1363_vm1, %v1347_v10 }
 0x50a   : > { %v1322_v60 = vpop.xlane.xlu1 %1321 }
 0x50b   : > { %v1350_v27 = vadd.f32 %v1322_v60, %v1302_v57 }
 0x50d   : > { %1367 = vst.msk [vmem:[#allocation4 + $0x18] sm:$0xff] %vm1363_vm1, %v1350_v27  ;;  %v1318_v21 = vpop.xlane.xlu0 %1317  ;;  %v1311_v27 = vmul.f32 %v3182_v54, %v1295_v37 }
 0x50e   : > { %v1348_v43 = vadd.f32 %v1318_v21, %v1300_v46  ;;  %v1312_v46 = vmul.f32 %v3175_v47, %v1296_v48 }
 0x510   : > { %1365 = vst.msk [vmem:[#allocation4 + $0x8] sm:$0xff] %vm1363_vm1, %v1348_v43 }
 0x512   : > { %v1328_v28 = vpop.xlane.xlu0 %1327 }
 0x513   : > { %v1353_v3 = vadd.f32 %v1328_v28, %v1305_v62  ;;  %v1380_v62 = vld [vmem:[#allocation5] sm:$0xff]  ;;  %v1383_v28 = vld [vmem:[#allocation5 + $0x18] sm:$0xff] }
 0x514   : > { %v1479_v54 = vmul.f32 %v3217_v51, %v1383_v28 }
 0x515   : > { %1370 = vst.msk [vmem:[#allocation4 + $0x30] sm:$0xff] %vm1363_vm1, %v1353_v3  ;;  %v1478_v3 = vmul.f32 %v3219_v2, %v1382_v32  ;;  %v1384_v2 = vld [vmem:[#allocation5 + $0x20] sm:$0xff] }
 0x516   : > { %v1324_v29 = vpop.xlane.xlu0 %1323  ;;  %v1480_v51 = vmul.f32 %v3223_v25, %v1384_v2  ;;  %v1389_v25 = vld [vmem:[#allocation5 + $0x48] sm:$0xff] }
 0x517   : > { %v1351_v61 = vadd.f32 %v1324_v29, %v1303_v13  ;;  %v1476_v13 = vmul.f32 %v3213_v26, %v1380_v62  ;;  %v1385_v26 = vld [vmem:[#allocation5 + $0x28] sm:$0xff] }
 0x519   : > { %1368 = vst.msk [vmem:[#allocation4 + $0x20] sm:$0xff] %vm1363_vm1, %v1351_v61 }
 0x51e   : > { %v1330_v1 = vpop.xlane.xlu1 %1329 }
 0x51f   : > { %v1354_v12 = vadd.f32 %v1330_v1, %v1306_v42 }
 0x521   : > { %1371 = vst.msk [vmem:[#allocation4 + $0x38] sm:$0xff] %vm1363_vm1, %v1354_v12 }
 0x522   : > { %v1326_v15 = vpop.xlane.xlu1 %1325 }
 0x523   : > { %v1352_v40 = vadd.f32 %v1326_v15, %v1304_v44  ;;  %v1386_v15 = vld [vmem:[#allocation5 + $0x30] sm:$0xff] }
 0x524   : > { %v1482_v4 = vmul.f32 %v3227_v52, %v1386_v15  ;;  %v1391_v52 = vld [vmem:[#allocation5 + $0x58] sm:$0xff] }
 0x525   : > { %1369 = vst.msk [vmem:[#allocation4 + $0x28] sm:$0xff] %vm1363_vm1, %v1352_v40 }
 0x526   : > { %v1336_v31 = vpop.xlane.xlu0 %1335  ;;  %v1338_v17 = vpop.xlane.xlu1 %1337 }
 0x527   : > { %v1357_v16 = vadd.f32 %v1336_v31, %v1309_v11  ;;  %v1358_v0 = vadd.f32 %v1338_v17, %v1310_v8  ;;  %v1481_v31 = vmul.f32 %v3221_v53, %v1385_v26  ;;  %v1487_v53 = vmul.f32 %v3229_v55, %v1391_v52 }
 0x529   : > { %1374 = vst.msk [vmem:[#allocation4 + $0x50] sm:$0xff] %vm1363_vm1, %v1357_v16  ;;  %1375 = vst.msk [vmem:[#allocation4 + $0x58] sm:$0xff] %vm1363_vm1, %v1358_v0  ;;  %v1390_v0 = vld [vmem:[#allocation5 + $0x50] sm:$0xff] }
 0x52a   : > { %v1332_v33 = vpop.xlane.xlu0 %1331  ;;  %v1334_v59 = vpop.xlane.xlu1 %1333 }
 0x52b   : > { %v1355_v5 = vadd.f32 %v1332_v33, %v1307_v19  ;;  %v1356_v14 = vadd.f32 %v1334_v59, %v1308_v6  ;;  %v1388_v6 = vld [vmem:[#allocation5 + $0x40] sm:$0xff]  ;;  %v1486_v33 = vmul.f32 %v3231_v56, %v1390_v0  ;;  %v1395_v56 = vld [vmem:[#allocation5 + $0x78] sm:$0xff] }
 0x52c   : > { %v1484_v50 = vmul.f32 %v3235_v58, %v1388_v6 }
 0x52d   : > { %1372 = vst.msk [vmem:[#allocation4 + $0x40] sm:$0xff] %vm1363_vm1, %v1355_v5  ;;  %1373 = vst.msk [vmem:[#allocation4 + $0x48] sm:$0xff] %vm1363_vm1, %v1356_v14  ;;  %v1485_v5 = vmul.f32 %v3233_v34, %v1389_v25 }
 0x52e   : > { %v1344_v10 = vpop.xlane.xlu0 %1343  ;;  %v1346_v57 = vpop.xlane.xlu1 %1345 }
 0x52f   : > { %v1361_v60 = vadd.f32 %v1344_v10, %v1313_v9  ;;  %v1362_v45 = vadd.f32 %v1346_v57, %v1314_v38  ;;  %v1394_v57 = vld [vmem:[#allocation5 + $0x70] sm:$0xff] }
 0x530   : > { %v1660_v2 = vld [vmem:[#allocation4 + $0x58] sm:$0xff] (!%p2033_p5)  ;;  %v1659_v26 = vld [vmem:[#allocation4 + $0x50] sm:$0xff] (!%p2033_p5) }
 0x531   : > { %1378 = vst.msk [vmem:[#allocation4 + $0x70] sm:$0xff] %vm1363_vm1, %v1361_v60  ;;  %1379 = vst.msk [vmem:[#allocation4 + $0x78] sm:$0xff] %vm1363_vm1, %v1362_v45  ;;  %v1392_v60 = vld [vmem:[#allocation5 + $0x60] sm:$0xff]  ;;  %v1393_v45 = vld [vmem:[#allocation5 + $0x68] sm:$0xff] }
 0x532   : > { %v1340_v21 = vpop.xlane.xlu0 %1339  ;;  %v1342_v43 = vpop.xlane.xlu1 %1341 }
 0x533   : > { %v1359_v49 = vadd.f32 %v1340_v21, %v1311_v27  ;;  %v1360_v23 = vadd.f32 %v1342_v43, %v1312_v46  ;;  %v1488_v27 = vmul.f32 %v3239_v39, %v1392_v60  ;;  %v1649_v39 = vld [vmem:[#allocation4] sm:$0xff] (!%p2033_p5) }
 0x535   : > { %1376 = vst.msk [vmem:[#allocation4 + $0x60] sm:$0xff] %vm1363_vm1, %v1359_v49  ;;  %1377 = vst.msk [vmem:[#allocation4 + $0x68] sm:$0xff] %vm1363_vm1, %v1360_v23  ;;  %v1489_v49 = vmul.f32 %v3237_v63, %v1393_v45  ;;  %v1650_v63 = vld [vmem:[#allocation4 + $0x8] sm:$0xff] (!%p2033_p5)  ;;  %v1814_v45 = vld [vmem:[%s2705_s11 + $0x18] sm:$0xff] (!%p2033_p5) }
 0x536   : > { %v1469_v37 = vpop.permute.xlu1 %1468 }
 0x537   : > { %v1490_v55 = vmul.f32 %v1469_v37, %v1394_v57 }
 0x53a   : > { %v1474_v58 = vpop.permute.xlu0 %1473 }
 0x53b   : > { %v1491_v34 = vmul.f32 %v1474_v58, %v1395_v56 }
 0x556   : > { %v2170_v29 = vpop.f32.mrb[0].mxu1 }
 0x557   : > { %v1599_v47 = vadd.f32 %v2170_v29, %v1478_v3  ;;  %v1534_v61 = vpop.f32.mrb[1].mxu1  ;;  %v1651_v3 = vld [vmem:[#allocation4 + $0x10] sm:$0xff] (!%p2033_p5)  ;;  %v2558_v29 = vmov (!%p2033_p5), 0  }
 0x558   : > { %v1597_v42 = vadd.f32 %v1534_v61, %v1476_v13  ;;  %v2171_v1 = vpop.f32.mrb[2].mxu1  ;;  %v1652_v13 = vld [vmem:[#allocation4 + $0x18] sm:$0xff] (!%p2033_p5)  ;;  %2409 = vset.pattern.permute.xlu1 (!%p2033_p5), %v2558_v29  ;;  %2408 = vset.pattern.permute.xlu0 (!%p2033_p5), %v2558_v29  ;;  %2410 = vrcp.f32 (!%p2033_p5), %v1651_v3  ;;  %v1815_v29 = vld [vmem:[%s2705_s11 + $0x20] sm:$0xff] (!%p2033_p5) }
 0x559   : > { %1615 = vst [vmem:[#allocation5 + $0x10] sm:$0xff] %v1599_v47  ;;  %v1600_v41 = vadd.f32 %v2171_v1, %v1479_v54  ;;  %v1537_v12 = vpop.f32.mrb[3].mxu1  ;;  %2412 = vrcp.f32 (!%p2033_p5), %v1649_v39  ;;  %v1654_v54 = vld [vmem:[#allocation4 + $0x28] sm:$0xff] (!%p2033_p5)  ;;  %v1653_v47 = vld [vmem:[#allocation4 + $0x20] sm:$0xff] (!%p2033_p5)  ;;  %v1656_v61 = vld [vmem:[#allocation4 + $0x38] sm:$0xff] (!%p2033_p5) }
 0x55a   : > { %1613 = vst [vmem:[#allocation5] sm:$0xff] %v1597_v42  ;;  %v1598_v44 = vadd.f32 %v1537_v12, %v1477_v18  ;;  %2414 = vrcp.f32 (!%p2033_p5), %v1652_v13  ;;  %v1655_v18 = vld [vmem:[#allocation4 + $0x30] sm:$0xff] (!%p2033_p5) }
 0x55b   : > { %1616 = vst [vmem:[#allocation5 + $0x18] sm:$0xff] %v1600_v41  ;;  %2416 = vrcp.f32 (!%p2033_p5), %v1650_v63  ;;  %v1658_v41 = vld [vmem:[#allocation4 + $0x48] sm:$0xff] (!%p2033_p5) }
 0x55c   : > { %1614 = vst [vmem:[#allocation5 + $0x8] sm:$0xff] %v1598_v44  ;;  %2418 = vrcp.f32 (!%p2033_p5), %v1654_v54  ;;  %v1657_v44 = vld [vmem:[#allocation4 + $0x40] sm:$0xff] (!%p2033_p5) }
 0x55d   : > { %2420 = vrcp.f32 (!%p2033_p5), %v1653_v47 }
 0x55e   : > { %2422 = vrcp.f32 (!%p2033_p5), %v1656_v61 }
 0x55f   : > { %2424 = vrcp.f32 (!%p2033_p5), %v1655_v18 }
 0x560   : > { %2426 = vrcp.f32 (!%p2033_p5), %v1658_v41  ;;  %v1683_v25 = vld [vmem:[#allocation5 + $0x10] sm:$0xff] (!%p2033_p5)  ;;  %v1818_v41 = vld [vmem:[%s2705_s11 + $0x38] sm:$0xff] (!%p2033_p5) }
 0x561   : > { %2428 = vrcp.f32 (!%p2033_p5), %v1657_v44 }
 0x562   : > { %v2411_v42 = vpop.eup (!%p2033_p5), %2410  ;;  %2430 = vrcp.f32 (!%p2033_p5), %v1660_v2  ;;  %v1817_v2 = vld [vmem:[%s2705_s11 + $0x30] sm:$0xff] (!%p2033_p5) }
 0x563   : > { %v2413_v1 = vpop.eup (!%p2033_p5), %2412  ;;  %1709 = vperm.xlu1 (!%p2033_p5), %2409, %v2411_v42   ;;  %2432 = vrcp.f32 (!%p2033_p5), %v1659_v26 }
 0x564   : > { %v2415_v12 = vpop.eup (!%p2033_p5), %2414  ;;  %1699 = vperm.xlu0 (!%p2033_p5), %2408, %v2413_v1  }
 0x565   : > { %v2417_v15 = vpop.eup (!%p2033_p5), %2416 }
 0x566   : > { %v2174_v40 = vpop.f32.mrb[4].mxu1  ;;  %v2419_v30 = vpop.eup (!%p2033_p5), %2418 }
 0x567   : > { %v1603_v11 = vadd.f32 %v2174_v40, %v1482_v4  ;;  %v1550_v8 = vpop.f32.mrb[5].mxu1  ;;  %1714 = vperm.xlu1 (!%p2033_p5), %2409, %v2415_v12   ;;  %v2421_v4 = vpop.eup (!%p2033_p5), %2420 }
 0x568   : > { %v1601_v17 = vadd.f32 %v1550_v8, %v1480_v51  ;;  %v2175_v22 = vpop.f32.mrb[6].mxu1  ;;  %1704 = vperm.xlu0 (!%p2033_p5), %2408, %v2417_v15   ;;  %v1662_v51 = vld [vmem:[#allocation4 + $0x68] sm:$0xff] (!%p2033_p5)  ;;  %v2423_v40 = vpop.eup (!%p2033_p5), %2422  ;;  %v1664_v8 = vld [vmem:[#allocation4 + $0x78] sm:$0xff] (!%p2033_p5) }
 0x569   : > { %1619 = vst [vmem:[#allocation5 + $0x30] sm:$0xff] %v1603_v11  ;;  %v1604_v20 = vadd.f32 %v2175_v22, %v1483_v36  ;;  %v1553_v16 = vpop.f32.mrb[7].mxu1  ;;  %v1661_v36 = vld [vmem:[#allocation4 + $0x60] sm:$0xff] (!%p2033_p5)  ;;  %v2425_v11 = vpop.eup (!%p2033_p5), %2424  ;;  %2434 = vrcp.f32 (!%p2033_p5), %v1662_v51 }
 0x56a   : > { %1617 = vst [vmem:[#allocation5 + $0x20] sm:$0xff] %v1601_v17  ;;  %v1602_v19 = vadd.f32 %v1553_v16, %v1481_v31  ;;  %2436 = vrcp.f32 (!%p2033_p5), %v1661_v36  ;;  %v2427_v31 = vpop.eup (!%p2033_p5), %2426  ;;  %v1663_v17 = vld [vmem:[#allocation4 + $0x70] sm:$0xff] (!%p2033_p5) }
 0x56b   : > { %1620 = vst [vmem:[#allocation5 + $0x38] sm:$0xff] %v1604_v20  ;;  %1724 = vperm.xlu1 (!%p2033_p5), %2409, %v2419_v30   ;;  %v2429_v22 = vpop.eup (!%p2033_p5), %2428  ;;  %2438 = vrcp.f32 (!%p2033_p5), %v1664_v8  ;;  %v1820_v8 = vld [vmem:[%s2705_s11 + $0x48] sm:$0xff] (!%p2033_p5) }
 0x56c   : > { %1618 = vst [vmem:[#allocation5 + $0x28] sm:$0xff] %v1602_v19  ;;  %1719 = vperm.xlu0 (!%p2033_p5), %2408, %v2421_v4   ;;  %2440 = vrcp.f32 (!%p2033_p5), %v1663_v17  ;;  %v2431_v20 = vpop.eup (!%p2033_p5), %2430 }
 0x56d   : > { %v2433_v16 = vpop.eup (!%p2033_p5), %2432 }
 0x56e   : > { %v2178_v59 = vpop.f32.mrb[8].mxu1 }
 0x56f   : > { %v1607_v7 = vadd.f32 %v2178_v59, %v1486_v33  ;;  %v1566_v24 = vpop.f32.mrb[9].mxu1  ;;  %1734 = vperm.xlu1 (!%p2033_p5), %2409, %v2423_v40   ;;  %v1681_v33 = vld [vmem:[#allocation5] sm:$0xff] (!%p2033_p5) }
 0x570   : > { %v1605_v14 = vadd.f32 %v1566_v24, %v1484_v50  ;;  %v2179_v9 = vpop.f32.mrb[10].mxu1  ;;  %1729 = vperm.xlu0 (!%p2033_p5), %2408, %v2425_v11   ;;  %v3288_v50 = vstv (!%p2033_p5), %s1793_s29  ;;  %v1813_v24 = vld [vmem:[%s2705_s11 + $0x10] sm:$0xff] (!%p2033_p5) }
 0x571   : > { %1623 = vst [vmem:[#allocation5 + $0x50] sm:$0xff] %v1607_v7  ;;  %v1608_v38 = vadd.f32 %v2179_v9, %v1487_v53  ;;  %v1569_v10 = vpop.f32.mrb[11].mxu1  ;;  %v1687_v63 = vld [vmem:[#allocation5 + $0x30] sm:$0xff] (!%p2033_p5) }
 0x572   : > { %1621 = vst [vmem:[#allocation5 + $0x40] sm:$0xff] %v1605_v14  ;;  %v1606_v48 = vadd.f32 %v1569_v10, %v1485_v5  ;;  %v1684_v14 = vld [vmem:[#allocation5 + $0x18] sm:$0xff] (!%p2033_p5)  ;;  %v1682_v10 = vld [vmem:[#allocation5 + $0x8] sm:$0xff] (!%p2033_p5) }
 0x573   : > { %1624 = vst [vmem:[#allocation5 + $0x58] sm:$0xff] %v1608_v38  ;;  %1744 = vperm.xlu1 (!%p2033_p5), %2409, %v2427_v31   ;;  %v2435_v0 = vpop.eup (!%p2033_p5), %2434  ;;  %v1811_v38 = vld [vmem:[%s2705_s11] sm:$0xff] (!%p2033_p5)  ;;  %v1688_v39 = vld [vmem:[#allocation5 + $0x38] sm:$0xff] (!%p2033_p5) }
 0x574   : > { %1622 = vst [vmem:[#allocation5 + $0x48] sm:$0xff] %v1606_v48  ;;  %1739 = vperm.xlu0 (!%p2033_p5), %2408, %v2429_v22   ;;  %v2437_v19 = vpop.eup (!%p2033_p5), %2436 }
 0x575   : > { %v2439_v6 = vpop.eup (!%p2033_p5), %2438 }
 0x576   : > { %v2182_v46 = vpop.f32.mrb[12].mxu1  ;;  %1648 = sbr.rel (%p2033_p5) target bundleno = 1543 (0x607), region = 60  ;;  %v2441_v52 = vpop.eup (!%p2033_p5), %2440 }
 0x577   : > { %v1611_v21 = vadd.f32 %v2182_v46, %v1490_v55  ;;  %v1582_v43 = vpop.f32.mrb[13].mxu1  ;;  %1754 = vperm.xlu1 (!%p2033_p5), %2409, %v2431_v20   ;;  %v1819_v20 = vld [vmem:[%s2705_s11 + $0x40] sm:$0xff] (!%p2033_p5) }
 0x578   : > { %v1609_v23 = vadd.f32 %v1582_v43, %v1488_v27  ;;  %v2183_v32 = vpop.f32.mrb[14].mxu1  ;;  %1749 = vperm.xlu0 (!%p2033_p5), %2408, %v2433_v16   ;;  %v1686_v27 = vld [vmem:[#allocation5 + $0x28] sm:$0xff] (!%p2033_p5)  ;;  %v1691_v16 = vld [vmem:[#allocation5 + $0x50] sm:$0xff] (!%p2033_p5) }
 0x579   : > { %1627 = vst [vmem:[#allocation5 + $0x70] sm:$0xff] %v1611_v21  ;;  %v1612_v62 = vadd.f32 %v2183_v32, %v1491_v34  ;;  %v1585_v28 = vpop.f32.mrb[15].mxu1  ;;  %v1812_v34 = vld [vmem:[%s2705_s11 + $0x8] sm:$0xff] (!%p2033_p5)  ;;  %v1685_v21 = vld [vmem:[#allocation5 + $0x20] sm:$0xff] (!%p2033_p5) }
 0x57a   : > { %1625 = vst [vmem:[#allocation5 + $0x60] sm:$0xff] %v1609_v23  ;;  %v1610_v35 = vadd.f32 %v1585_v28, %v1489_v49  ;;  %v1689_v30 = vld [vmem:[#allocation5 + $0x40] sm:$0xff] (!%p2033_p5)  ;;  %v1692_v17 = vld [vmem:[#allocation5 + $0x58] sm:$0xff] (!%p2033_p5) }
 0x57b   : > { %1628 = vst [vmem:[#allocation5 + $0x78] sm:$0xff] %v1612_v62  ;;  %1764 = vperm.xlu1 (!%p2033_p5), %2409, %v2435_v0   ;;  %v1690_v44 = vld [vmem:[#allocation5 + $0x48] sm:$0xff] (!%p2033_p5) }
 0x57c   : > { %1626 = vst [vmem:[#allocation5 + $0x68] sm:$0xff] %v1610_v35  ;;  %1759 = vperm.xlu0 (!%p2033_p5), %2408, %v2437_v19   ;;  %v1816_v35 = vld [vmem:[%s2705_s11 + $0x28] sm:$0xff] (!%p2033_p5) }
 0x57f   : > { %1774 = vperm.xlu1 %2409, %v2439_v6  }
 0x580   : > { %1769 = vperm.xlu0 %2408, %v2441_v52  }
 0x5e2   : > { %v1710_v59 = vpop.permute.xlu1 %1709 }
 0x5e3   : > { %v1779_v53 = vmul.f32 %v1710_v59, %v1683_v25  ;;  %v1700_v7 = vpop.permute.xlu0 %1699  ;;  %v1822_v59 = vld [vmem:[%s2705_s11 + $0x58] sm:$0xff] }
 0x5e4   : > { %v1777_v5 = vmul.f32 %v1700_v7, %v1681_v33  ;;  %v1694_v7 = vld [vmem:[#allocation5 + $0x68] sm:$0xff] }
 0x5e5   : > { %v1797_v9 = vmul.f32 %v3288_v50, %v1779_v53 }
 0x5e6   : > { %v1795_v57 = vmul.f32 %v3288_v50, %v1777_v5  ;;  %v1715_v37 = vpop.permute.xlu1 %1714  ;;  %v1821_v5 = vld [vmem:[%s2705_s11 + $0x50] sm:$0xff] }
 0x5e7   : > { %v1829_v48 = vadd.f32 %v1813_v24, %v1797_v9  ;;  %v1780_v60 = vmul.f32 %v1715_v37, %v1684_v14  ;;  %v1705_v56 = vpop.permute.xlu0 %1704  ;;  %v1693_v14 = vld [vmem:[#allocation5 + $0x60] sm:$0xff] }
 0x5e8   : > { %v1827_v58 = vadd.f32 %v1811_v38, %v1795_v57  ;;  %v1778_v55 = vmul.f32 %v1705_v56, %v1682_v10 }
 0x5e9   : > { %1845 = vst [vmem:[%s2713_s13 + $0x10] sm:$0xff] %v1829_v48  ;;  %v1798_v46 = vmul.f32 %v3288_v50, %v1780_v60  ;;  %v1824_v60 = vld [vmem:[%s2705_s11 + $0x68] sm:$0xff] }
 0x5ea   : > { %1843 = vst [vmem:[%s2713_s13] sm:$0xff] %v1827_v58  ;;  %v1796_v43 = vmul.f32 %v3288_v50, %v1778_v55  ;;  %v1725_v49 = vpop.permute.xlu1 %1724  ;;  %v1696_v58 = vld [vmem:[#allocation5 + $0x78] sm:$0xff]  ;;  %v1823_v55 = vld [vmem:[%s2705_s11 + $0x60] sm:$0xff] }
 0x5eb   : > { %v1830_v23 = vadd.f32 %v1814_v45, %v1798_v46  ;;  %v1782_v32 = vmul.f32 %v1725_v49, %v1686_v27  ;;  %v1720_v62 = vpop.permute.xlu0 %1719  ;;  %v1695_v27 = vld [vmem:[#allocation5 + $0x70] sm:$0xff] }
 0x5ec   : > { %v1828_v28 = vadd.f32 %v1812_v34, %v1796_v43  ;;  %v1781_v3 = vmul.f32 %v1720_v62, %v1685_v21 }
 0x5ed   : > { %1846 = vst [vmem:[%s2713_s13 + $0x18] sm:$0xff] %v1830_v23  ;;  %v1800_v13 = vmul.f32 %v3288_v50, %v1782_v32  ;;  %v1826_v32 = vld [vmem:[%s2705_s11 + $0x78] sm:$0xff] }
 0x5ee   : > { %1844 = vst [vmem:[%s2713_s13 + $0x8] sm:$0xff] %v1828_v28  ;;  %v1799_v54 = vmul.f32 %v3288_v50, %v1781_v3  ;;  %v1735_v47 = vpop.permute.xlu1 %1734 }
 0x5ef   : > { %v1832_v61 = vadd.f32 %v1816_v35, %v1800_v13  ;;  %v1784_v18 = vmul.f32 %v1735_v47, %v1688_v39  ;;  %v1730_v42 = vpop.permute.xlu0 %1729  ;;  %v1825_v35 = vld [vmem:[%s2705_s11 + $0x70] sm:$0xff] }
 0x5f0   : > { %v1831_v1 = vadd.f32 %v1815_v29, %v1799_v54  ;;  %v1783_v12 = vmul.f32 %v1730_v42, %v1687_v63 }
 0x5f1   : > { %1848 = vst [vmem:[%s2713_s13 + $0x28] sm:$0xff] %v1832_v61  ;;  %v1802_v15 = vmul.f32 %v3288_v50, %v1784_v18 }
 0x5f2   : > { %1847 = vst [vmem:[%s2713_s13 + $0x20] sm:$0xff] %v1831_v1  ;;  %v1801_v26 = vmul.f32 %v3288_v50, %v1783_v12  ;;  %v1745_v4 = vpop.permute.xlu1 %1744 }
 0x5f3   : > { %v1834_v51 = vadd.f32 %v1818_v41, %v1802_v15  ;;  %v1786_v40 = vmul.f32 %v1745_v4, %v1690_v44  ;;  %v1740_v36 = vpop.permute.xlu0 %1739 }
 0x5f4   : > { %v1833_v11 = vadd.f32 %v1817_v2, %v1801_v26  ;;  %v1785_v31 = vmul.f32 %v1740_v36, %v1689_v30 }
 0x5f5   : > { %1850 = vst [vmem:[%s2713_s13 + $0x38] sm:$0xff] %v1834_v51  ;;  %v1804_v22 = vmul.f32 %v3288_v50, %v1786_v40 }
 0x5f6   : > { %1849 = vst [vmem:[%s2713_s13 + $0x30] sm:$0xff] %v1833_v11  ;;  %v1803_v0 = vmul.f32 %v3288_v50, %v1785_v31  ;;  %v1755_v19 = vpop.permute.xlu1 %1754 }
 0x5f7   : > { %v1836_v6 = vadd.f32 %v1820_v8, %v1804_v22  ;;  %v1788_v52 = vmul.f32 %v1755_v19, %v1692_v17  ;;  %v1750_v25 = vpop.permute.xlu0 %1749 }
 0x5f8   : > { %v1835_v33 = vadd.f32 %v1819_v20, %v1803_v0  ;;  %v1787_v53 = vmul.f32 %v1750_v25, %v1691_v16 }
 0x5f9   : > { %1852 = vst [vmem:[%s2713_s13 + $0x48] sm:$0xff] %v1836_v6  ;;  %v1806_v24 = vmul.f32 %v3288_v50, %v1788_v52 }
 0x5fa   : > { %1851 = vst [vmem:[%s2713_s13 + $0x40] sm:$0xff] %v1835_v33  ;;  %v1805_v9 = vmul.f32 %v3288_v50, %v1787_v53  ;;  %v1765_v38 = vpop.permute.xlu1 %1764 }
 0x5fb   : > { %v1838_v10 = vadd.f32 %v1822_v59, %v1806_v24  ;;  %v1790_v57 = vmul.f32 %v1765_v38, %v1694_v7  ;;  %v1760_v37 = vpop.permute.xlu0 %1759 }
 0x5fc   : > { %v1837_v48 = vadd.f32 %v1821_v5, %v1805_v9  ;;  %v1789_v56 = vmul.f32 %v1760_v37, %v1693_v14 }
 0x5fd   : > { %1854 = vst [vmem:[%s2713_s13 + $0x58] sm:$0xff] %v1838_v10  ;;  %v1808_v45 = vmul.f32 %v3288_v50, %v1790_v57 }
 0x5fe   : > { %1853 = vst [vmem:[%s2713_s13 + $0x50] sm:$0xff] %v1837_v48  ;;  %v1807_v46 = vmul.f32 %v3288_v50, %v1789_v56  ;;  %v1775_v34 = vpop.permute.xlu1 %1774 }
 0x5ff   : > { %v1840_v21 = vadd.f32 %v1824_v60, %v1808_v45  ;;  %v1792_v43 = vmul.f32 %v1775_v34, %v1696_v58  ;;  %v1770_v49 = vpop.permute.xlu0 %1769 }
 0x600   : > { %v1839_v23 = vadd.f32 %v1823_v55, %v1807_v46  ;;  %v1791_v62 = vmul.f32 %v1770_v49, %v1695_v27 }
 0x601   : > { %1856 = vst [vmem:[%s2713_s13 + $0x68] sm:$0xff] %v1840_v21  ;;  %v1810_v28 = vmul.f32 %v3288_v50, %v1792_v43 }
 0x602   : > { %1855 = vst [vmem:[%s2713_s13 + $0x60] sm:$0xff] %v1839_v23  ;;  %v1809_v3 = vmul.f32 %v3288_v50, %v1791_v62 }
 0x603   : > { %v1842_v39 = vadd.f32 %v1826_v32, %v1810_v28 }
 0x604   : > { %v1841_v13 = vadd.f32 %v1825_v35, %v1809_v3 }
 0x605   : > { %1858 = vst [vmem:[%s2713_s13 + $0x78] sm:$0xff] %v1842_v39 }
 0x606   : > { %1857 = vst [vmem:[%s2713_s13 + $0x70] sm:$0xff] %v1841_v13 }
 0x607 PF: > { %s2036_s9 = sshll.u32 %s2536_s8, 5  ;;  %s1875_s16 = sshll.u32 %s2713_s13, 4  ;;  %s3341_s16 = int_to_ptr.vmem [resolvable:$true] %s1875_s16 }
 0x608   : > { %s1872_s10 = sadd.s32 %s2036_s9, %s2692_s25  ;;  %s3437_s12 = sand.u32 1, %s2520_s27  }
 0x609   : > { %s2037_s18 = sshll.u32 %s1872_s10, 7  ;;  %s3350_s19 = scalar_lea.sflag [#allocation10], %s3437_s12 }
 0x60a   : > { %s3346_s24 = scalar_lea.hbm %s3415_s7, %s2037_s18  ;;  %s2442_s30 = scalar_lea.vmem %s3341_s16, 2048 }
 0x60b   : > { %p2443_p8 = scmp.ne.s32.totalorder %s3341_s16, %s2442_s30  ;;  %s2559_s8 = smov [#allocation9]  }
 0x60c   : > { %s2446_s25 = sshll.u32 %s2559_s8, 4  ;;  %s2447_s25 = int_to_ptr.vmem [resolvable:$false] %s2446_s25 }
 0x60d   : > { %p2444_p9 = pnand %p2443_p8, %p2667_p6  ;;  %s2448_s13 = scalar_lea.vmem %s2447_s25, 4096 }
 0x60e   : > { %p2449_p11 = scmp.lt.s32.totalorder %s3341_s16, %s2447_s25  ;;  %p2450_p12 = scmp.lt.s32.totalorder %s2448_s13, %s2442_s30 }
 0x60f   : > { %p2445_p10 = pneg %p2444_p9 }
 0x610   : > { %p2451_p13 = por %p2450_p12, %p2449_p11 }
 0x612   : > { %p2452_p0 = pnand %p2451_p13, %p2445_p10 }
 0x614   : > { %2455 = shalt.err (!%p2452_p0)
}
 0x615   : > { %s2456_s26 = scalar_lea.hbm %s3346_s24, 2048  ;;  %s2460_s14 = scalar_lea.hbm %s3415_s7, 8192 }
 0x616   : > { %p2457_p1 = scmp.ne.s32.totalorder %s3346_s24, %s2456_s26  ;;  %p2461_p4 = scmp.lt.u32.totalorder %s3346_s24, %s3415_s7 }
 0x617   : > { %p2462_p5 = scmp.lt.u32.totalorder %s2460_s14, %s2456_s26  ;;  %p2464_p9 = scmp.lt.u32.totalorder %s2456_s26, %s3346_s24 }
 0x618   : > { %p2458_p2 = pnand %p2457_p1, %p2667_p6 }
 0x619   : > { %p2463_p8 = por %p2462_p5, %p2461_p4 }
 0x61a   : > { %p2459_p3 = pneg %p2458_p2 }
 0x61b   : > { %p2465_p10 = por %p2464_p9, %p2463_p8 }
 0x61d   : > { %p2466_p11 = pnand %p2465_p10, %p2459_p3 }
 0x61f   : > { %2469 = shalt.err (!%p2466_p11)
}
 0x620   : > { %s2560_s22 = smov 128   ;;  %s2561_s29 = smov 8  }
 0x621   : > { %2216 = dma.vmem_to_hbm [thread:$0]  (%p2667_p6), %s3341_s16, 2048, %s3346_s24, %s3350_s19, %s2560_s22, %s2560_s22, %s2561_s29  }
 0x622 PF: > { %s3438_s9 = sld [smem:[#allocation12_spill]]  ;;  %p2222_p12 = scmp.ge.s32.totalorder %s2552_s0, 2 }
 0x624   : > { %p2219_p13 = pnand %p2222_p12, %p2674_p7 }
 0x628   : > { %s1890_s18 = sand.u32 1, %s3438_s9  }
 0x629   : > { %s1891_s11 = scalar_lea.sflag [#allocation10], %s1890_s18 }
 0x62a   : > { %2511 = dma.done.wait (!%p2219_p13), %s1891_s11, 2048  }
 0x62b   : > { %2513 = vsyncadd (!%p2219_p13), %s1891_s11, 4294965248  ;;  %s21_s0 = sadd.s32 1, %s2552_s0   ;;  %s3440_s23 = sld [smem:[#allocation13_spill]] }
 0x62c   : > { %p18_p0 = scmp.ge.s32.totalorder %s21_s0, 10   ;;  %s3441_s28 = sld [smem:[#allocation21_spill]] }
 0x62d   : > { %s3442_s29 = sld [smem:[#allocation14_spill]]  ;;  %s3443_s30 = sld [smem:[#allocation15_spill]] }
 0x62e   : > { %s3444_s8 = sld [smem:[#allocation16_spill]]  ;;  %s3445_s9 = sld [smem:[#allocation17_spill]] }
 0x62f   : > { %s3446_s10 = sld [smem:[#allocation18_spill]]  ;;  %s3447_s11 = sld [smem:[#allocation20_spill]] }
 0x630   : > { %s3448_s26 = smov %s2520_s27  ;;  %20 = sbr.rel (!%p18_p0) target bundleno = 8 (0x8), region = 102 }
 0x631   : > { %s3449_s27 = smov %s3440_s23 }
 0x637   :  { %1896 = vsyncpa [#allocation10], 1 }
 0x638   :  { %1898 = vsyncpa [#allocation10 + $0x1], 1 }

</bundles_post_ra>
